<compile_context>
chip_gen: v6e
topology: v6e:2x2x1
jax: 0.10.0
libtpu: 0.0.40
codegen_flags: <defaults>
</compile_context>

<pallas_src>
from functools import partial

import jax
import jax.numpy as jnp
from jax.experimental import pallas as pl
from jax.experimental.pallas import tpu as pltpu


def _round_up(v, m):
    return (v + m - 1) // m * m


# ---------------------------------------------------------------------------
# Fused BasicBlock kernel (specialized on static config via a factory)
# ---------------------------------------------------------------------------
def _make_basic_block_kernel(*, stride, ho, wo, hph, cin, cp,
                             has_conv_shortcut, use_bf16):
    s = stride
    m = ho * wo
    taps = [(kh, kw) for kh in range(3) for kw in range(3)]
    mm_dtype = jnp.bfloat16 if use_bf16 else jnp.float32

    def tap_slice(xph_ref, kh, kw):
        # Tap (kh, kw) of the stride-s 3x3 conv == unit-stride window of phase
        # (kh % s, kw % s) at offset (kh // s, kw // s) of the phase array.
        p, oh = kh % s, kh // s
        q, ow = kw % s, kw // s
        r0 = (p * s + q) * hph + oh
        return xph_ref[0, r0:r0 + ho, ow:ow + wo, :]

    def kernel(*refs):
        if has_conv_shortcut:
            (xph_ref, w1_ref, b1_ref, w2_ref, b2_ref, ws_ref, bs_ref,
             out_ref, o1_ref) = refs
        else:
            xph_ref, w1_ref, b1_ref, w2_ref, b2_ref, out_ref, o1_ref = refs

        # ---- conv1: 3x3 stride-s, in-kernel tap accumulation (no HBM im2col)
        acc1 = jnp.zeros((m, cp), jnp.float32)
        for t, (kh, kw) in enumerate(taps):
            patch = tap_slice(xph_ref, kh, kw).reshape(m, cin)
            acc1 = acc1 + jnp.dot(patch.astype(mm_dtype),
                                  w1_ref[t].astype(mm_dtype),
                                  preferred_element_type=jnp.float32)
        out1 = jnp.maximum(acc1 + b1_ref[...], 0.0)

        # Keep out1 resident in VMEM (zero halo) -> conv2 reads it directly,
        # no HBM round trip of the intermediate activation.
        o1_ref[...] = jnp.zeros_like(o1_ref)
        o1_ref[1:1 + ho, 1:1 + wo, :] = out1.reshape(ho, wo, cp)

        # ---- conv2: 3x3 stride-1 over the VMEM-resident out1 ----------------
        acc2 = jnp.zeros((m, cp), jnp.float32)
        for t, (kh, kw) in enumerate(taps):
            patch = o1_ref[kh:kh + ho, kw:kw + wo, :].reshape(m, cp)
            acc2 = acc2 + jnp.dot(patch.astype(mm_dtype),
                                  w2_ref[t].astype(mm_dtype),
                                  preferred_element_type=jnp.float32)
        acc2 = acc2 + b2_ref[...]

        # ---- shortcut: the pixels it reads are exactly tap (1, 1) -----------
        x_sc = tap_slice(xph_ref, 1, 1).reshape(m, cin)
        if has_conv_shortcut:
            sc = jnp.dot(x_sc.astype(mm_dtype), ws_ref[...].astype(mm_dtype),
                         preferred_element_type=jnp.float32) + bs_ref[...]
        else:
            sc = x_sc.astype(jnp.float32)
            if cp > cin:  # pad identity shortcut up to lane-dense Cp columns
                sc = jnp.concatenate(
                    [sc, jnp.zeros((m, cp - cin), jnp.float32)], axis=-1)

        out = jnp.maximum(acc2 + sc, 0.0)
        out_ref[0] = out.reshape(ho, wo, cp).astype(out_ref.dtype)

    return kernel


# ---------------------------------------------------------------------------
# Wrapper: layout plumbing + pallas_call
# ---------------------------------------------------------------------------
@partial(jax.jit, static_argnames=("stride", "use_bf16"))
def basic_block_forward(x_nchw, params, stride, *, use_bf16=False):
    """BasicBlock.forward — x_nchw:(N, Cin, H, W) -> (N, planes, Ho, Wo)."""
    x = jnp.transpose(x_nchw, (0, 2, 3, 1)).astype(jnp.float32)  # NCHW -> NHWC
    n, h, w, cin = x.shape
    planes = params["w1"].shape[0]
    s = stride
    ho = (h + 2 - 3) // s + 1
    wo = (w + 2 - 3) // s + 1
    hph = ho + 2 // s                    # per-phase rows (covers max tap offset)
    wph = wo + 2 // s
    cp = _round_up(planes, 128)          # lane-dense Cout -> unmasked stores
    w_dtype = jnp.bfloat16 if use_bf16 else jnp.float32

    # Phase decomposition of the padded input: 1x HBM traffic, and every
    # (kh, kw) tap becomes a unit-stride static slice inside the kernel.
    xp = jnp.pad(x, ((0, 0), (1, 1), (1, 1), (0, 0)))
    phases = []
    for p in range(s):
        for q in range(s):
            ph = xp[:, p::s, q::s, :][:, :hph, :wph, :]
            pad_h, pad_w = hph - ph.shape[1], wph - ph.shape[2]
            if pad_h or pad_w:
                ph = jnp.pad(ph, ((0, 0), (0, pad_h), (0, pad_w), (0, 0)))
            phases.append(ph)
    xph = jnp.concatenate(phases, axis=1)            # (N, s*s*Hph, Wph, Cin)

    # Weights in per-tap matmul form; Cout (and conv2's Cin) padded to Cp.
    def pad_last(a, target):
        return jnp.pad(a, [(0, 0)] * (a.ndim - 1) + [(0, target - a.shape[-1])])

    w1 = jnp.transpose(params["w1"], (2, 3, 1, 0)).reshape(9, cin, planes)
    w1 = pad_last(w1, cp).astype(w_dtype)                          # (9, Cin, Cp)
    b1 = pad_last(params["b1"].reshape(1, planes), cp)             # (1, Cp) f32
    w2 = jnp.transpose(params["w2"], (2, 3, 1, 0)).reshape(9, planes, planes)
    w2 = jnp.pad(w2, ((0, 0), (0, cp - planes), (0, cp - planes))).astype(w_dtype)
    b2 = pad_last(params["b2"].reshape(1, planes), cp)

    has_conv_shortcut = "ws" in params
    inputs = [xph, w1, b1, w2, b2]
    # Weight/bias index_maps are constant -> fetched once across the grid.
    # (On v7x, pipeline_mode=pl.Buffered(1) on these specs would also reclaim
    #  the unused second buffer; omitted here for maximum compatibility.)
    in_specs = [
        pl.BlockSpec((1,) + xph.shape[1:], lambda i: (i, 0, 0, 0)),
        pl.BlockSpec(w1.shape, lambda i: (0, 0, 0)),
        pl.BlockSpec(b1.shape, lambda i: (0, 0)),
        pl.BlockSpec(w2.shape, lambda i: (0, 0, 0)),
        pl.BlockSpec(b2.shape, lambda i: (0, 0)),
    ]
    if has_conv_shortcut:
        ws = pad_last(params["ws"].reshape(planes, cin).T, cp).astype(w_dtype)
        bs = pad_last(params["bs"].reshape(1, planes), cp)
        inputs += [ws, bs]
        in_specs += [pl.BlockSpec(ws.shape, lambda i: (0, 0)),
                     pl.BlockSpec(bs.shape, lambda i: (0, 0))]

    kernel = _make_basic_block_kernel(
        stride=s, ho=ho, wo=wo, hph=hph, cin=cin, cp=cp,
        has_conv_shortcut=has_conv_shortcut, use_bf16=use_bf16)

    m = ho * wo
    flops = 2 * n * m * cp * (9 * cin + 9 * cp + (cin if has_conv_shortcut else 0))
    bytes_accessed = (sum(int(a.size) * a.dtype.itemsize for a in inputs)
                      + n * ho * wo * cp * 4)
    cost = pl.CostEstimate(flops=int(flops), transcendentals=0,
                           bytes_accessed=int(bytes_accessed))

    out_padded = pl.pallas_call(
        kernel,
        out_shape=jax.ShapeDtypeStruct((n, ho, wo, cp), jnp.float32),
        grid_spec=pltpu.PrefetchScalarGridSpec(
            num_scalar_prefetch=0,
            grid=(n,),                               # batch grid, >= 2 steps
            in_specs=in_specs,
            out_specs=pl.BlockSpec((1, ho, wo, cp), lambda i: (i, 0, 0, 0)),
            scratch_shapes=[pltpu.VMEM((ho + 2, wo + 2, cp), jnp.float32)],
        ),
        compiler_params=pltpu.CompilerParams(
            dimension_semantics=("parallel",),
            vmem_limit_bytes=64 * 1024 * 1024,
        ),
        cost_estimate=cost,
    )(*inputs)
    # TODO(synk): for very large H*W*C, add a spatial grid axis with a 1-pixel
    # halo (and a Cout axis when planes >= 256) to bound per-step VMEM.

    out = out_padded[..., :planes]                   # drop Cout lane padding
    return jnp.transpose(out, (0, 3, 1, 2))          # NHWC -> NCHW


# ---------------------------------------------------------------------------
# Parameter init (matches nn.Conv2d defaults) + pure-JAX reference
# ---------------------------------------------------------------------------
def init_basic_block_params(key, in_planes, planes, stride):
    ks = jax.random.split(key, 6)

    def conv_w(k, cout, cin, kh, kw):
        bound = 1.0 / float(jnp.sqrt(cin * kh * kw))
        return jax.random.uniform(k, (cout, cin, kh, kw), jnp.float32, -bound, bound)

    def conv_b(k, cout, fan_in):
        bound = 1.0 / float(jnp.sqrt(fan_in))
        return jax.random.uniform(k, (cout,), jnp.float32, -bound, bound)

    params = {
        "w1": conv_w(ks[0], planes, in_planes, 3, 3),
        "b1": conv_b(ks[1], planes, in_planes * 9),
        "w2": conv_w(ks[2], planes, planes, 3, 3),
        "b2": conv_b(ks[3], planes, planes * 9),
    }
    if stride != 1 or in_planes != planes:  # expansion == 1
        params["ws"] = conv_w(ks[4], planes, in_planes, 1, 1)
        params["bs"] = conv_b(ks[5], planes, in_planes)
    return params


def basic_block_reference(x, params, stride):
    dn = ("NCHW", "OIHW", "NCHW")

    def conv(xx, w, b, s, pad):
        y = jax.lax.conv_general_dilated(
            xx, w, (s, s), [(pad, pad), (pad, pad)], dimension_numbers=dn)
        return y + b.reshape(1, -1, 1, 1)

    out = jax.nn.relu(conv(x, params["w1"], params["b1"], stride, 1))
    out = conv(out, params["w2"], params["b2"], 1, 1)
    sc = conv(x, params["ws"], params["bs"], stride, 0) if "ws" in params else x
    return jax.nn.relu(out + sc)


if __name__ == "__main__":
    key = jax.random.PRNGKey(0)
    kx, kp1, kp2 = jax.random.split(key, 3)

    # Config 1: downsampling block (stride=2, in_planes != planes) -> conv shortcut
    x1 = jax.random.normal(kx, (2, 4, 16, 16), jnp.float32)
    params1 = init_basic_block_params(kp1, in_planes=4, planes=8, stride=2)
    y1 = jax.block_until_ready(basic_block_forward(x1, params1, stride=2))
    r1 = basic_block_reference(x1, params1, 2)
    assert y1.shape == (2, 8, 8, 8)
    assert jnp.allclose(y1, r1, atol=1e-4, rtol=1e-4)

    # Config 2: identity-shortcut block (stride=1, in_planes == planes)
    x2 = jax.random.normal(kx, (2, 8, 16, 16), jnp.float32)
    params2 = init_basic_block_params(kp2, in_planes=8, planes=8, stride=1)
    y2 = jax.block_until_ready(basic_block_forward(x2, params2, stride=1))
    r2 = basic_block_reference(x2, params2, 1)
    assert y2.shape == (2, 8, 16, 16)
    assert jnp.allclose(y2, r2, atol=1e-4, rtol=1e-4)

    # bf16-MXU path (v6e/v7x feedback): fp32 accumulation, looser tolerance.
    y1b = jax.block_until_ready(
        basic_block_forward(x1, params1, stride=2, use_bf16=True))
    assert y1b.shape == (2, 8, 8, 8)
    assert jnp.allclose(y1b, r1, atol=5e-2, rtol=5e-2)

    print("KERNEL_OK")
</pallas_src>

<mosaic_0001>
module attributes {stable_mosaic.version = 11 : i64} {
  func.func @kernel(%arg0: i32, %arg1: memref<1x36x9x4xf32, #tpu.memory_space<vmem>>, %arg2: memref<9x4x128xf32, #tpu.memory_space<vmem>>, %arg3: memref<1x128xf32, #tpu.memory_space<vmem>>, %arg4: memref<9x128x128xf32, #tpu.memory_space<vmem>>, %arg5: memref<1x128xf32, #tpu.memory_space<vmem>>, %arg6: memref<4x128xf32, #tpu.memory_space<vmem>>, %arg7: memref<1x128xf32, #tpu.memory_space<vmem>>, %arg8: memref<1x8x8x128xf32, #tpu.memory_space<vmem>>, %arg9: memref<10x10x128xf32, #tpu.memory_space<vmem>>) attributes {dimension_semantics = [#tpu.dimension_semantics<parallel>], iteration_bounds = array<i64: 2>, scalar_prefetch = 0 : i64, scratch_operands = 1 : i64, tpu.core_type = #tpu.core_type<tc>, window_params = [{transform_indices = @transform_0, window_bounds = array<i64: 1, 36, 9, 4>}, {pipeline_mode = #tpu.pipeline_mode<synchronous>, transform_indices = @transform_1, window_bounds = array<i64: 9, 4, 128>}, {pipeline_mode = #tpu.pipeline_mode<synchronous>, transform_indices = @transform_2, window_bounds = array<i64: 1, 128>}, {pipeline_mode = #tpu.pipeline_mode<synchronous>, transform_indices = @transform_3, window_bounds = array<i64: 9, 128, 128>}, {pipeline_mode = #tpu.pipeline_mode<synchronous>, transform_indices = @transform_4, window_bounds = array<i64: 1, 128>}, {pipeline_mode = #tpu.pipeline_mode<synchronous>, transform_indices = @transform_5, window_bounds = array<i64: 4, 128>}, {pipeline_mode = #tpu.pipeline_mode<synchronous>, transform_indices = @transform_6, window_bounds = array<i64: 1, 128>}, {transform_indices = @transform_7, window_bounds = array<i64: 1, 8, 8, 128>}]} {
    %cst = arith.constant 0.000000e+00 : f32
    %0 = vector.broadcast %cst : f32 to vector<64x128xf32>
    %c0 = arith.constant 0 : index
    %c0_0 = arith.constant 0 : index
    %c0_1 = arith.constant 0 : index
    %c0_2 = arith.constant 0 : index
    %1 = vector.load %arg1[%c0, %c0_0, %c0_1, %c0_2] : memref<1x36x9x4xf32, #tpu.memory_space<vmem>>, vector<1x8x8x4xf32>
    %2 = vector.shape_cast %1 : vector<1x8x8x4xf32> to vector<8x8x4xf32>
    %3 = vector.shape_cast %2 : vector<8x8x4xf32> to vector<64x4xf32>
    %c0_3 = arith.constant 0 : index
    %c0_4 = arith.constant 0 : index
    %c0_5 = arith.constant 0 : index
    %4 = vector.load %arg2[%c0_3, %c0_4, %c0_5] : memref<9x4x128xf32, #tpu.memory_space<vmem>>, vector<1x4x128xf32>
    %5 = vector.shape_cast %4 : vector<1x4x128xf32> to vector<4x128xf32>
    %cst_6 = arith.constant dense<0.000000e+00> : vector<64x128xf32>
    %6 = tpu.matmul %3, %5, %cst_6 {dimension_numbers = #tpu.dot_dimension_numbers<[1], [0], [0], [1], [0, 0, 1, 1], [], []>} : vector<64x4xf32>, vector<4x128xf32>, vector<64x128xf32> -> vector<64x128xf32>
    %7 = arith.addf %0, %6 : vector<64x128xf32>
    %c0_7 = arith.constant 0 : index
    %c9 = arith.constant 9 : index
    %c0_8 = arith.constant 0 : index
    %c0_9 = arith.constant 0 : index
    %8 = vector.load %arg1[%c0_7, %c9, %c0_8, %c0_9] : memref<1x36x9x4xf32, #tpu.memory_space<vmem>>, vector<1x8x8x4xf32>
    %9 = vector.shape_cast %8 : vector<1x8x8x4xf32> to vector<8x8x4xf32>
    %10 = vector.shape_cast %9 : vector<8x8x4xf32> to vector<64x4xf32>
    %c1 = arith.constant 1 : index
    %c0_10 = arith.constant 0 : index
    %c0_11 = arith.constant 0 : index
    %11 = vector.load %arg2[%c1, %c0_10, %c0_11] : memref<9x4x128xf32, #tpu.memory_space<vmem>>, vector<1x4x128xf32>
    %12 = vector.shape_cast %11 : vector<1x4x128xf32> to vector<4x128xf32>
    %cst_12 = arith.constant dense<0.000000e+00> : vector<64x128xf32>
    %13 = tpu.matmul %10, %12, %cst_12 {dimension_numbers = #tpu.dot_dimension_numbers<[1], [0], [0], [1], [0, 0, 1, 1], [], []>} : vector<64x4xf32>, vector<4x128xf32>, vector<64x128xf32> -> vector<64x128xf32>
    %14 = arith.addf %7, %13 : vector<64x128xf32>
    %c0_13 = arith.constant 0 : index
    %c0_14 = arith.constant 0 : index
    %c1_15 = arith.constant 1 : index
    %c0_16 = arith.constant 0 : index
    %15 = vector.load %arg1[%c0_13, %c0_14, %c1_15, %c0_16] : memref<1x36x9x4xf32, #tpu.memory_space<vmem>>, vector<1x8x8x4xf32>
    %16 = vector.shape_cast %15 : vector<1x8x8x4xf32> to vector<8x8x4xf32>
    %17 = vector.shape_cast %16 : vector<8x8x4xf32> to vector<64x4xf32>
    %c2 = arith.constant 2 : index
    %c0_17 = arith.constant 0 : index
    %c0_18 = arith.constant 0 : index
    %18 = vector.load %arg2[%c2, %c0_17, %c0_18] : memref<9x4x128xf32, #tpu.memory_space<vmem>>, vector<1x4x128xf32>
    %19 = vector.shape_cast %18 : vector<1x4x128xf32> to vector<4x128xf32>
    %cst_19 = arith.constant dense<0.000000e+00> : vector<64x128xf32>
    %20 = tpu.matmul %17, %19, %cst_19 {dimension_numbers = #tpu.dot_dimension_numbers<[1], [0], [0], [1], [0, 0, 1, 1], [], []>} : vector<64x4xf32>, vector<4x128xf32>, vector<64x128xf32> -> vector<64x128xf32>
    %21 = arith.addf %14, %20 : vector<64x128xf32>
    %c0_20 = arith.constant 0 : index
    %c18 = arith.constant 18 : index
    %c0_21 = arith.constant 0 : index
    %c0_22 = arith.constant 0 : index
    %22 = vector.load %arg1[%c0_20, %c18, %c0_21, %c0_22] : memref<1x36x9x4xf32, #tpu.memory_space<vmem>>, vector<1x8x8x4xf32>
    %23 = vector.shape_cast %22 : vector<1x8x8x4xf32> to vector<8x8x4xf32>
    %24 = vector.shape_cast %23 : vector<8x8x4xf32> to vector<64x4xf32>
    %c3 = arith.constant 3 : index
    %c0_23 = arith.constant 0 : index
    %c0_24 = arith.constant 0 : index
    %25 = vector.load %arg2[%c3, %c0_23, %c0_24] : memref<9x4x128xf32, #tpu.memory_space<vmem>>, vector<1x4x128xf32>
    %26 = vector.shape_cast %25 : vector<1x4x128xf32> to vector<4x128xf32>
    %cst_25 = arith.constant dense<0.000000e+00> : vector<64x128xf32>
    %27 = tpu.matmul %24, %26, %cst_25 {dimension_numbers = #tpu.dot_dimension_numbers<[1], [0], [0], [1], [0, 0, 1, 1], [], []>} : vector<64x4xf32>, vector<4x128xf32>, vector<64x128xf32> -> vector<64x128xf32>
    %28 = arith.addf %21, %27 : vector<64x128xf32>
    %c0_26 = arith.constant 0 : index
    %c27 = arith.constant 27 : index
    %c0_27 = arith.constant 0 : index
    %c0_28 = arith.constant 0 : index
    %29 = vector.load %arg1[%c0_26, %c27, %c0_27, %c0_28] : memref<1x36x9x4xf32, #tpu.memory_space<vmem>>, vector<1x8x8x4xf32>
    %30 = vector.shape_cast %29 : vector<1x8x8x4xf32> to vector<8x8x4xf32>
    %31 = vector.shape_cast %30 : vector<8x8x4xf32> to vector<64x4xf32>
    %c4 = arith.constant 4 : index
    %c0_29 = arith.constant 0 : index
    %c0_30 = arith.constant 0 : index
    %32 = vector.load %arg2[%c4, %c0_29, %c0_30] : memref<9x4x128xf32, #tpu.memory_space<vmem>>, vector<1x4x128xf32>
    %33 = vector.shape_cast %32 : vector<1x4x128xf32> to vector<4x128xf32>
    %cst_31 = arith.constant dense<0.000000e+00> : vector<64x128xf32>
    %34 = tpu.matmul %31, %33, %cst_31 {dimension_numbers = #tpu.dot_dimension_numbers<[1], [0], [0], [1], [0, 0, 1, 1], [], []>} : vector<64x4xf32>, vector<4x128xf32>, vector<64x128xf32> -> vector<64x128xf32>
    %35 = arith.addf %28, %34 : vector<64x128xf32>
    %c0_32 = arith.constant 0 : index
    %c18_33 = arith.constant 18 : index
    %c1_34 = arith.constant 1 : index
    %c0_35 = arith.constant 0 : index
    %36 = vector.load %arg1[%c0_32, %c18_33, %c1_34, %c0_35] : memref<1x36x9x4xf32, #tpu.memory_space<vmem>>, vector<1x8x8x4xf32>
    %37 = vector.shape_cast %36 : vector<1x8x8x4xf32> to vector<8x8x4xf32>
    %38 = vector.shape_cast %37 : vector<8x8x4xf32> to vector<64x4xf32>
    %c5 = arith.constant 5 : index
    %c0_36 = arith.constant 0 : index
    %c0_37 = arith.constant 0 : index
    %39 = vector.load %arg2[%c5, %c0_36, %c0_37] : memref<9x4x128xf32, #tpu.memory_space<vmem>>, vector<1x4x128xf32>
    %40 = vector.shape_cast %39 : vector<1x4x128xf32> to vector<4x128xf32>
    %cst_38 = arith.constant dense<0.000000e+00> : vector<64x128xf32>
    %41 = tpu.matmul %38, %40, %cst_38 {dimension_numbers = #tpu.dot_dimension_numbers<[1], [0], [0], [1], [0, 0, 1, 1], [], []>} : vector<64x4xf32>, vector<4x128xf32>, vector<64x128xf32> -> vector<64x128xf32>
    %42 = arith.addf %35, %41 : vector<64x128xf32>
    %c0_39 = arith.constant 0 : index
    %c1_40 = arith.constant 1 : index
    %c0_41 = arith.constant 0 : index
    %c0_42 = arith.constant 0 : index
    %43 = vector.load %arg1[%c0_39, %c1_40, %c0_41, %c0_42] : memref<1x36x9x4xf32, #tpu.memory_space<vmem>>, vector<1x8x8x4xf32>
    %44 = vector.shape_cast %43 : vector<1x8x8x4xf32> to vector<8x8x4xf32>
    %45 = vector.shape_cast %44 : vector<8x8x4xf32> to vector<64x4xf32>
    %c6 = arith.constant 6 : index
    %c0_43 = arith.constant 0 : index
    %c0_44 = arith.constant 0 : index
    %46 = vector.load %arg2[%c6, %c0_43, %c0_44] : memref<9x4x128xf32, #tpu.memory_space<vmem>>, vector<1x4x128xf32>
    %47 = vector.shape_cast %46 : vector<1x4x128xf32> to vector<4x128xf32>
    %cst_45 = arith.constant dense<0.000000e+00> : vector<64x128xf32>
    %48 = tpu.matmul %45, %47, %cst_45 {dimension_numbers = #tpu.dot_dimension_numbers<[1], [0], [0], [1], [0, 0, 1, 1], [], []>} : vector<64x4xf32>, vector<4x128xf32>, vector<64x128xf32> -> vector<64x128xf32>
    %49 = arith.addf %42, %48 : vector<64x128xf32>
    %c0_46 = arith.constant 0 : index
    %c10 = arith.constant 10 : index
    %c0_47 = arith.constant 0 : index
    %c0_48 = arith.constant 0 : index
    %50 = vector.load %arg1[%c0_46, %c10, %c0_47, %c0_48] : memref<1x36x9x4xf32, #tpu.memory_space<vmem>>, vector<1x8x8x4xf32>
    %51 = vector.shape_cast %50 : vector<1x8x8x4xf32> to vector<8x8x4xf32>
    %52 = vector.shape_cast %51 : vector<8x8x4xf32> to vector<64x4xf32>
    %c7 = arith.constant 7 : index
    %c0_49 = arith.constant 0 : index
    %c0_50 = arith.constant 0 : index
    %53 = vector.load %arg2[%c7, %c0_49, %c0_50] : memref<9x4x128xf32, #tpu.memory_space<vmem>>, vector<1x4x128xf32>
    %54 = vector.shape_cast %53 : vector<1x4x128xf32> to vector<4x128xf32>
    %cst_51 = arith.constant dense<0.000000e+00> : vector<64x128xf32>
    %55 = tpu.matmul %52, %54, %cst_51 {dimension_numbers = #tpu.dot_dimension_numbers<[1], [0], [0], [1], [0, 0, 1, 1], [], []>} : vector<64x4xf32>, vector<4x128xf32>, vector<64x128xf32> -> vector<64x128xf32>
    %56 = arith.addf %49, %55 : vector<64x128xf32>
    %c0_52 = arith.constant 0 : index
    %c1_53 = arith.constant 1 : index
    %c1_54 = arith.constant 1 : index
    %c0_55 = arith.constant 0 : index
    %57 = vector.load %arg1[%c0_52, %c1_53, %c1_54, %c0_55] : memref<1x36x9x4xf32, #tpu.memory_space<vmem>>, vector<1x8x8x4xf32>
    %58 = vector.shape_cast %57 : vector<1x8x8x4xf32> to vector<8x8x4xf32>
    %59 = vector.shape_cast %58 : vector<8x8x4xf32> to vector<64x4xf32>
    %c8 = arith.constant 8 : index
    %c0_56 = arith.constant 0 : index
    %c0_57 = arith.constant 0 : index
    %60 = vector.load %arg2[%c8, %c0_56, %c0_57] : memref<9x4x128xf32, #tpu.memory_space<vmem>>, vector<1x4x128xf32>
    %61 = vector.shape_cast %60 : vector<1x4x128xf32> to vector<4x128xf32>
    %cst_58 = arith.constant dense<0.000000e+00> : vector<64x128xf32>
    %62 = tpu.matmul %59, %61, %cst_58 {dimension_numbers = #tpu.dot_dimension_numbers<[1], [0], [0], [1], [0, 0, 1, 1], [], []>} : vector<64x4xf32>, vector<4x128xf32>, vector<64x128xf32> -> vector<64x128xf32>
    %63 = arith.addf %56, %62 : vector<64x128xf32>
    %c0_59 = arith.constant 0 : index
    %c0_60 = arith.constant 0 : index
    %64 = vector.load %arg3[%c0_59, %c0_60] : memref<1x128xf32, #tpu.memory_space<vmem>>, vector<1x128xf32>
    %65 = vector.broadcast %64 : vector<1x128xf32> to vector<64x128xf32>
    %66 = arith.addf %63, %65 : vector<64x128xf32>
    %cst_61 = arith.constant 0.000000e+00 : f32
    %67 = vector.broadcast %cst_61 : f32 to vector<64x128xf32>
    %68 = arith.maximumf %66, %67 : vector<64x128xf32>
    %cst_62 = arith.constant 0.000000e+00 : f32
    %69 = vector.broadcast %cst_62 : f32 to vector<10x10x128xf32>
    %c0_63 = arith.constant 0 : index
    %c0_64 = arith.constant 0 : index
    %c0_65 = arith.constant 0 : index
    %70 = vector.load %arg9[%c0_63, %c0_64, %c0_65] : memref<10x10x128xf32, #tpu.memory_space<vmem>>, vector<10x10x128xf32>
    tpu.vector_store %arg9[%c0_63, %c0_64, %c0_65], %69 {strides = array<i32>} : memref<10x10x128xf32, #tpu.memory_space<vmem>>, vector<10x10x128xf32>,
    %71 = vector.shape_cast %68 : vector<64x128xf32> to vector<8x8x128xf32>
    %c1_66 = arith.constant 1 : index
    %c1_67 = arith.constant 1 : index
    %c0_68 = arith.constant 0 : index
    %72 = vector.load %arg9[%c1_66, %c1_67, %c0_68] : memref<10x10x128xf32, #tpu.memory_space<vmem>>, vector<8x8x128xf32>
    tpu.vector_store %arg9[%c1_66, %c1_67, %c0_68], %71 {strides = array<i32>} : memref<10x10x128xf32, #tpu.memory_space<vmem>>, vector<8x8x128xf32>,
    %cst_69 = arith.constant 0.000000e+00 : f32
    %73 = vector.broadcast %cst_69 : f32 to vector<64x128xf32>
    %c0_70 = arith.constant 0 : index
    %c0_71 = arith.constant 0 : index
    %c0_72 = arith.constant 0 : index
    %74 = vector.load %arg9[%c0_70, %c0_71, %c0_72] : memref<10x10x128xf32, #tpu.memory_space<vmem>>, vector<8x8x128xf32>
    %75 = vector.shape_cast %74 : vector<8x8x128xf32> to vector<64x128xf32>
    %c0_73 = arith.constant 0 : index
    %c0_74 = arith.constant 0 : index
    %c0_75 = arith.constant 0 : index
    %76 = vector.load %arg4[%c0_73, %c0_74, %c0_75] : memref<9x128x128xf32, #tpu.memory_space<vmem>>, vector<1x128x128xf32>
    %77 = vector.shape_cast %76 : vector<1x128x128xf32> to vector<128x128xf32>
    %cst_76 = arith.constant dense<0.000000e+00> : vector<64x128xf32>
    %78 = tpu.matmul %75, %77, %cst_76 {dimension_numbers = #tpu.dot_dimension_numbers<[1], [0], [0], [1], [0, 0, 1, 1], [], []>} : vector<64x128xf32>, vector<128x128xf32>, vector<64x128xf32> -> vector<64x128xf32>
    %79 = arith.addf %73, %78 : vector<64x128xf32>
    %c0_77 = arith.constant 0 : index
    %c1_78 = arith.constant 1 : index
    %c0_79 = arith.constant 0 : index
    %80 = vector.load %arg9[%c0_77, %c1_78, %c0_79] : memref<10x10x128xf32, #tpu.memory_space<vmem>>, vector<8x8x128xf32>
    %81 = vector.shape_cast %80 : vector<8x8x128xf32> to vector<64x128xf32>
    %c1_80 = arith.constant 1 : index
    %c0_81 = arith.constant 0 : index
    %c0_82 = arith.constant 0 : index
    %82 = vector.load %arg4[%c1_80, %c0_81, %c0_82] : memref<9x128x128xf32, #tpu.memory_space<vmem>>, vector<1x128x128xf32>
    %83 = vector.shape_cast %82 : vector<1x128x128xf32> to vector<128x128xf32>
    %cst_83 = arith.constant dense<0.000000e+00> : vector<64x128xf32>
    %84 = tpu.matmul %81, %83, %cst_83 {dimension_numbers = #tpu.dot_dimension_numbers<[1], [0], [0], [1], [0, 0, 1, 1], [], []>} : vector<64x128xf32>, vector<128x128xf32>, vector<64x128xf32> -> vector<64x128xf32>
    %85 = arith.addf %79, %84 : vector<64x128xf32>
    %c0_84 = arith.constant 0 : index
    %c2_85 = arith.constant 2 : index
    %c0_86 = arith.constant 0 : index
    %86 = vector.load %arg9[%c0_84, %c2_85, %c0_86] : memref<10x10x128xf32, #tpu.memory_space<vmem>>, vector<8x8x128xf32>
    %87 = vector.shape_cast %86 : vector<8x8x128xf32> to vector<64x128xf32>
    %c2_87 = arith.constant 2 : index
    %c0_88 = arith.constant 0 : index
    %c0_89 = arith.constant 0 : index
    %88 = vector.load %arg4[%c2_87, %c0_88, %c0_89] : memref<9x128x128xf32, #tpu.memory_space<vmem>>, vector<1x128x128xf32>
    %89 = vector.shape_cast %88 : vector<1x128x128xf32> to vector<128x128xf32>
    %cst_90 = arith.constant dense<0.000000e+00> : vector<64x128xf32>
    %90 = tpu.matmul %87, %89, %cst_90 {dimension_numbers = #tpu.dot_dimension_numbers<[1], [0], [0], [1], [0, 0, 1, 1], [], []>} : vector<64x128xf32>, vector<128x128xf32>, vector<64x128xf32> -> vector<64x128xf32>
    %91 = arith.addf %85, %90 : vector<64x128xf32>
    %c1_91 = arith.constant 1 : index
    %c0_92 = arith.constant 0 : index
    %c0_93 = arith.constant 0 : index
    %92 = vector.load %arg9[%c1_91, %c0_92, %c0_93] : memref<10x10x128xf32, #tpu.memory_space<vmem>>, vector<8x8x128xf32>
    %93 = vector.shape_cast %92 : vector<8x8x128xf32> to vector<64x128xf32>
    %c3_94 = arith.constant 3 : index
    %c0_95 = arith.constant 0 : index
    %c0_96 = arith.constant 0 : index
    %94 = vector.load %arg4[%c3_94, %c0_95, %c0_96] : memref<9x128x128xf32, #tpu.memory_space<vmem>>, vector<1x128x128xf32>
    %95 = vector.shape_cast %94 : vector<1x128x128xf32> to vector<128x128xf32>
    %cst_97 = arith.constant dense<0.000000e+00> : vector<64x128xf32>
    %96 = tpu.matmul %93, %95, %cst_97 {dimension_numbers = #tpu.dot_dimension_numbers<[1], [0], [0], [1], [0, 0, 1, 1], [], []>} : vector<64x128xf32>, vector<128x128xf32>, vector<64x128xf32> -> vector<64x128xf32>
    %97 = arith.addf %91, %96 : vector<64x128xf32>
    %c1_98 = arith.constant 1 : index
    %c1_99 = arith.constant 1 : index
    %c0_100 = arith.constant 0 : index
    %98 = vector.load %arg9[%c1_98, %c1_99, %c0_100] : memref<10x10x128xf32, #tpu.memory_space<vmem>>, vector<8x8x128xf32>
    %99 = vector.shape_cast %98 : vector<8x8x128xf32> to vector<64x128xf32>
    %c4_101 = arith.constant 4 : index
    %c0_102 = arith.constant 0 : index
    %c0_103 = arith.constant 0 : index
    %100 = vector.load %arg4[%c4_101, %c0_102, %c0_103] : memref<9x128x128xf32, #tpu.memory_space<vmem>>, vector<1x128x128xf32>
    %101 = vector.shape_cast %100 : vector<1x128x128xf32> to vector<128x128xf32>
    %cst_104 = arith.constant dense<0.000000e+00> : vector<64x128xf32>
    %102 = tpu.matmul %99, %101, %cst_104 {dimension_numbers = #tpu.dot_dimension_numbers<[1], [0], [0], [1], [0, 0, 1, 1], [], []>} : vector<64x128xf32>, vector<128x128xf32>, vector<64x128xf32> -> vector<64x128xf32>
    %103 = arith.addf %97, %102 : vector<64x128xf32>
    %c1_105 = arith.constant 1 : index
    %c2_106 = arith.constant 2 : index
    %c0_107 = arith.constant 0 : index
    %104 = vector.load %arg9[%c1_105, %c2_106, %c0_107] : memref<10x10x128xf32, #tpu.memory_space<vmem>>, vector<8x8x128xf32>
    %105 = vector.shape_cast %104 : vector<8x8x128xf32> to vector<64x128xf32>
    %c5_108 = arith.constant 5 : index
    %c0_109 = arith.constant 0 : index
    %c0_110 = arith.constant 0 : index
    %106 = vector.load %arg4[%c5_108, %c0_109, %c0_110] : memref<9x128x128xf32, #tpu.memory_space<vmem>>, vector<1x128x128xf32>
    %107 = vector.shape_cast %106 : vector<1x128x128xf32> to vector<128x128xf32>
    %cst_111 = arith.constant dense<0.000000e+00> : vector<64x128xf32>
    %108 = tpu.matmul %105, %107, %cst_111 {dimension_numbers = #tpu.dot_dimension_numbers<[1], [0], [0], [1], [0, 0, 1, 1], [], []>} : vector<64x128xf32>, vector<128x128xf32>, vector<64x128xf32> -> vector<64x128xf32>
    %109 = arith.addf %103, %108 : vector<64x128xf32>
    %c2_112 = arith.constant 2 : index
    %c0_113 = arith.constant 0 : index
    %c0_114 = arith.constant 0 : index
    %110 = vector.load %arg9[%c2_112, %c0_113, %c0_114] : memref<10x10x128xf32, #tpu.memory_space<vmem>>, vector<8x8x128xf32>
    %111 = vector.shape_cast %110 : vector<8x8x128xf32> to vector<64x128xf32>
    %c6_115 = arith.constant 6 : index
    %c0_116 = arith.constant 0 : index
    %c0_117 = arith.constant 0 : index
    %112 = vector.load %arg4[%c6_115, %c0_116, %c0_117] : memref<9x128x128xf32, #tpu.memory_space<vmem>>, vector<1x128x128xf32>
    %113 = vector.shape_cast %112 : vector<1x128x128xf32> to vector<128x128xf32>
    %cst_118 = arith.constant dense<0.000000e+00> : vector<64x128xf32>
    %114 = tpu.matmul %111, %113, %cst_118 {dimension_numbers = #tpu.dot_dimension_numbers<[1], [0], [0], [1], [0, 0, 1, 1], [], []>} : vector<64x128xf32>, vector<128x128xf32>, vector<64x128xf32> -> vector<64x128xf32>
    %115 = arith.addf %109, %114 : vector<64x128xf32>
    %c2_119 = arith.constant 2 : index
    %c1_120 = arith.constant 1 : index
    %c0_121 = arith.constant 0 : index
    %116 = vector.load %arg9[%c2_119, %c1_120, %c0_121] : memref<10x10x128xf32, #tpu.memory_space<vmem>>, vector<8x8x128xf32>
    %117 = vector.shape_cast %116 : vector<8x8x128xf32> to vector<64x128xf32>
    %c7_122 = arith.constant 7 : index
    %c0_123 = arith.constant 0 : index
    %c0_124 = arith.constant 0 : index
    %118 = vector.load %arg4[%c7_122, %c0_123, %c0_124] : memref<9x128x128xf32, #tpu.memory_space<vmem>>, vector<1x128x128xf32>
    %119 = vector.shape_cast %118 : vector<1x128x128xf32> to vector<128x128xf32>
    %cst_125 = arith.constant dense<0.000000e+00> : vector<64x128xf32>
    %120 = tpu.matmul %117, %119, %cst_125 {dimension_numbers = #tpu.dot_dimension_numbers<[1], [0], [0], [1], [0, 0, 1, 1], [], []>} : vector<64x128xf32>, vector<128x128xf32>, vector<64x128xf32> -> vector<64x128xf32>
    %121 = arith.addf %115, %120 : vector<64x128xf32>
    %c2_126 = arith.constant 2 : index
    %c2_127 = arith.constant 2 : index
    %c0_128 = arith.constant 0 : index
    %122 = vector.load %arg9[%c2_126, %c2_127, %c0_128] : memref<10x10x128xf32, #tpu.memory_space<vmem>>, vector<8x8x128xf32>
    %123 = vector.shape_cast %122 : vector<8x8x128xf32> to vector<64x128xf32>
    %c8_129 = arith.constant 8 : index
    %c0_130 = arith.constant 0 : index
    %c0_131 = arith.constant 0 : index
    %124 = vector.load %arg4[%c8_129, %c0_130, %c0_131] : memref<9x128x128xf32, #tpu.memory_space<vmem>>, vector<1x128x128xf32>
    %125 = vector.shape_cast %124 : vector<1x128x128xf32> to vector<128x128xf32>
    %cst_132 = arith.constant dense<0.000000e+00> : vector<64x128xf32>
    %126 = tpu.matmul %123, %125, %cst_132 {dimension_numbers = #tpu.dot_dimension_numbers<[1], [0], [0], [1], [0, 0, 1, 1], [], []>} : vector<64x128xf32>, vector<128x128xf32>, vector<64x128xf32> -> vector<64x128xf32>
    %127 = arith.addf %121, %126 : vector<64x128xf32>
    %c0_133 = arith.constant 0 : index
    %c0_134 = arith.constant 0 : index
    %128 = vector.load %arg5[%c0_133, %c0_134] : memref<1x128xf32, #tpu.memory_space<vmem>>, vector<1x128xf32>
    %129 = vector.broadcast %128 : vector<1x128xf32> to vector<64x128xf32>
    %130 = arith.addf %127, %129 : vector<64x128xf32>
    %c0_135 = arith.constant 0 : index
    %c27_136 = arith.constant 27 : index
    %c0_137 = arith.constant 0 : index
    %c0_138 = arith.constant 0 : index
    %131 = vector.load %arg1[%c0_135, %c27_136, %c0_137, %c0_138] : memref<1x36x9x4xf32, #tpu.memory_space<vmem>>, vector<1x8x8x4xf32>
    %132 = vector.shape_cast %131 : vector<1x8x8x4xf32> to vector<8x8x4xf32>
    %133 = vector.shape_cast %132 : vector<8x8x4xf32> to vector<64x4xf32>
    %c0_139 = arith.constant 0 : index
    %c0_140 = arith.constant 0 : index
    %134 = vector.load %arg6[%c0_139, %c0_140] : memref<4x128xf32, #tpu.memory_space<vmem>>, vector<4x128xf32>
    %cst_141 = arith.constant dense<0.000000e+00> : vector<64x128xf32>
    %135 = tpu.matmul %133, %134, %cst_141 {dimension_numbers = #tpu.dot_dimension_numbers<[1], [0], [0], [1], [0, 0, 1, 1], [], []>} : vector<64x4xf32>, vector<4x128xf32>, vector<64x128xf32> -> vector<64x128xf32>
    %c0_142 = arith.constant 0 : index
    %c0_143 = arith.constant 0 : index
    %136 = vector.load %arg7[%c0_142, %c0_143] : memref<1x128xf32, #tpu.memory_space<vmem>>, vector<1x128xf32>
    %137 = vector.broadcast %136 : vector<1x128xf32> to vector<64x128xf32>
    %138 = arith.addf %135, %137 : vector<64x128xf32>
    %139 = arith.addf %130, %138 : vector<64x128xf32>
    %cst_144 = arith.constant 0.000000e+00 : f32
    %140 = vector.broadcast %cst_144 : f32 to vector<64x128xf32>
    %141 = arith.maximumf %139, %140 : vector<64x128xf32>
    %142 = vector.shape_cast %141 : vector<64x128xf32> to vector<8x8x128xf32>
    %c0_145 = arith.constant 0 : index
    %c0_146 = arith.constant 0 : index
    %c0_147 = arith.constant 0 : index
    %c0_148 = arith.constant 0 : index
    %143 = vector.load %arg8[%c0_145, %c0_146, %c0_147, %c0_148] : memref<1x8x8x128xf32, #tpu.memory_space<vmem>>, vector<1x8x8x128xf32>
    %144 = vector.shape_cast %143 : vector<1x8x8x128xf32> to vector<8x8x128xf32>
    %145 = vector.shape_cast %142 : vector<8x8x128xf32> to vector<1x8x8x128xf32>
    tpu.vector_store %arg8[%c0_145, %c0_146, %c0_147, %c0_148], %145 {strides = array<i32>} : memref<1x8x8x128xf32, #tpu.memory_space<vmem>>, vector<1x8x8x128xf32>,
    return
  }
  func.func @transform_0(%arg0: i32) -> (i32, i32, i32, i32) {
    %c0_i32 = arith.constant 0 : i32
    %c0_i32_0 = arith.constant 0 : i32
    %c0_i32_1 = arith.constant 0 : i32
    %c0_i32_2 = arith.constant 0 : i32
    return %arg0, %c0_i32, %c0_i32_0, %c0_i32_1 : i32, i32, i32, i32
  }
  func.func @transform_1(%arg0: i32) -> (i32, i32, i32) {
    %c0_i32 = arith.constant 0 : i32
    %c0_i32_0 = arith.constant 0 : i32
    %c0_i32_1 = arith.constant 0 : i32
    %c0_i32_2 = arith.constant 0 : i32
    return %c0_i32, %c0_i32_0, %c0_i32_1 : i32, i32, i32
  }
  func.func @transform_2(%arg0: i32) -> (i32, i32) {
    %c0_i32 = arith.constant 0 : i32
    %c0_i32_0 = arith.constant 0 : i32
    %c0_i32_1 = arith.constant 0 : i32
    return %c0_i32, %c0_i32_0 : i32, i32
  }
  func.func @transform_3(%arg0: i32) -> (i32, i32, i32) {
    %c0_i32 = arith.constant 0 : i32
    %c0_i32_0 = arith.constant 0 : i32
    %c0_i32_1 = arith.constant 0 : i32
    %c0_i32_2 = arith.constant 0 : i32
    return %c0_i32, %c0_i32_0, %c0_i32_1 : i32, i32, i32
  }
  func.func @transform_4(%arg0: i32) -> (i32, i32) {
    %c0_i32 = arith.constant 0 : i32
    %c0_i32_0 = arith.constant 0 : i32
    %c0_i32_1 = arith.constant 0 : i32
    return %c0_i32, %c0_i32_0 : i32, i32
  }
  func.func @transform_5(%arg0: i32) -> (i32, i32) {
    %c0_i32 = arith.constant 0 : i32
    %c0_i32_0 = arith.constant 0 : i32
    %c0_i32_1 = arith.constant 0 : i32
    return %c0_i32, %c0_i32_0 : i32, i32
  }
  func.func @transform_6(%arg0: i32) -> (i32, i32) {
    %c0_i32 = arith.constant 0 : i32
    %c0_i32_0 = arith.constant 0 : i32
    %c0_i32_1 = arith.constant 0 : i32
    return %c0_i32, %c0_i32_0 : i32, i32
  }
  func.func @transform_7(%arg0: i32) -> (i32, i32, i32, i32) {
    %c0_i32 = arith.constant 0 : i32
    %c0_i32_0 = arith.constant 0 : i32
    %c0_i32_1 = arith.constant 0 : i32
    %c0_i32_2 = arith.constant 0 : i32
    return %arg0, %c0_i32, %c0_i32_0, %c0_i32_1 : i32, i32, i32, i32
  }
}

</mosaic_0001>

<bundles_post_ra>
// kernel: basic_block_forward.1
= control target key start
LH: loop header
LB: loop body
LE: loop exit
PB: predicated region body
PF: predicated region fallthrough
CT: control target
= control target key end

     0   :  { %s4345_s24 = smov 0   ;;  %s5359_s0 = inlined_call_operand.vmem [shape: f32[2,36,9,4], index: 0, kind: input, shape index: {}]   ;;  %s5360_s1 = inlined_call_operand.vmem [shape: f32[9,4,128], index: 1, kind: input, shape index: {}]   ;;  %s5361_s2 = inlined_call_operand.vmem [shape: f32[1,128], index: 2, kind: input, shape index: {}]   ;;  %s5362_s3 = inlined_call_operand.vmem [shape: f32[9,128,128], index: 3, kind: input, shape index: {}]   ;;  %s5363_s4 = inlined_call_operand.vmem [shape: f32[1,128], index: 4, kind: input, shape index: {}]   ;;  %s5364_s5 = inlined_call_operand.vmem [shape: f32[4,128], index: 5, kind: input, shape index: {}]   ;;  %s5365_s6 = inlined_call_operand.vmem [shape: f32[1,128], index: 6, kind: input, shape index: {}]   ;;  %s5366_s7 = inlined_call_operand.vmem [shape: f32[2,8,8,128], index: 7, kind: output, shape index: {}]  }
   0x1 LB: > { %s3139_s25 = sadd.s32 4294967295, %s4302_s24   ;;  %p3143_p0 = scmp.ge.s32.totalorder %s4302_s24, 1  ;;  %s4302_s24 = sphi %s4345_s24, %s17_s24  }
   0x2   : > { %p237_p1 = scmp.lt.s32.totalorder %s4302_s24, 3 }
   0x4   : > { %p238_p2 = pnand %p3143_p0, %p237_p1 }
   0x6   : > { %241 = sbr.rel (%p238_p2) target bundleno = 655 (0x28f), region = 48 }
   0xb   : > { %v3155_v0 = vld [vmem:[%s5360_s1 + $0x4] sm:$0xf]  ;;  %vm324_vm0 = vcmask 1043456   ;;  %v287_v1 = vld [vmem:[%s5360_s1] sm:$0xf]  ;;  %p269_p3 = scmp.lt.s32.totalorder %s3139_s25, 1 }
   0xc   : > { %3749 = vmatprep.subr.msk.mxu0 %vm324_vm0, %v3155_v0  ;;  %3763 = vmatprep.subr.msk.mxu1 %vm324_vm0, %v287_v1  ;;  %v3174_v2 = vld [vmem:[%s5360_s1 + $0x8] sm:$0xf]  ;;  %v3192_v3 = vld [vmem:[%s5360_s1 + $0xc] sm:$0xf]  ;;  %vm299_vm1 = vcmask 31744   ;;  %v3308_v60 = vld [vmem:[%s5362_s3 + $0xf8] sm:$0xff] }
   0xd   : > { %3750 = vmatpush3.msk.msra.mxu0 %vm324_vm0, %v3155_v0  ;;  %s5402_s25 = smov (!%p269_p3, %s3139_s25), 1  ;;  %3764 = vmatpush3.msk.msra.mxu1 %vm324_vm0, %v287_v1  ;;  %v3210_v10 = vld [vmem:[%s5360_s1 + $0x10] sm:$0xf]  ;;  %v3228_v11 = vld [vmem:[%s5360_s1 + $0x14] sm:$0xf]  ;;  %v3306_v62 = vld [vmem:[%s5362_s3 + $0xe8] sm:$0xff] }
   0xe   : > { %3777 = vmatprep.subr.msk.mxu0 %vm324_vm0, %v3174_v2  ;;  %3791 = vmatprep.subr.msk.mxu1 %vm324_vm0, %v3192_v3  ;;  %s4285_s11 = smul.u32 576, %s5402_s25  ;;  %v3246_v28 = vld [vmem:[%s5360_s1 + $0x18] sm:$0xf]  ;;  %v3264_v29 = vld [vmem:[%s5360_s1 + $0x1c] sm:$0xf]  ;;  %v3307_v61 = vld [vmem:[%s5362_s3 + $0xf0] sm:$0xff] }
   0xf   : > { %v3282_v46 = vld [vmem:[%s5360_s1 + $0x20] sm:$0xf]  ;;  %v1694_v0 = vld [vmem:[%s5362_s3 + $0x78] sm:$0xff]  ;;  %s3442_s20 = sshll.u32 %s5402_s25, 6 }
  0x10   : > { %s4377_s14 = scalar_lea.vmem %s5359_s0, %s4285_s11  ;;  %v3305_v63 = vld [vmem:[%s5362_s3 + $0xe0] sm:$0xff]  ;;  %v3304_v1 = vld [vmem:[%s5362_s3 + $0xd8] sm:$0xff]  ;;  %s5331_s22 = scalar_lea.vmem %s5366_s7, %s3442_s20 }
  0x11   : > { %v3147_v4 = vld [vmem:[%s4377_s14 + $0x90] sm:$0xff]  ;;  %v279_v5 = vld [vmem:[%s4377_s14] sm:$0xff] }
  0x12   : > { %v4382_v6 = vld [vmem:[%s4377_s14 + $0xa0] sm:$0xff]  ;;  %3751 = vmatprep.mubr.msk.f32.mxu0 %vm299_vm1, %v3147_v4  ;;  %3765 = vmatprep.mubr.msk.f32.mxu1 %vm299_vm1, %v279_v5  ;;  %v4387_v7 = vld [vmem:[%s4377_s14 + $0x10] sm:$0xff]  ;;  %v1692_v4 = vld [vmem:[%s5362_s3 + $0x68] sm:$0xff] }
  0x13   : > { %v4390_v8 = vld [vmem:[%s4377_s14 + $0xb0] sm:$0xff]  ;;  %v4393_v9 = vld [vmem:[%s4377_s14 + $0x20] sm:$0xff]  ;;  %3752 = vmatmul.mubr.msk.f32.vlgmr.msra.gmra.mxu0 %vm299_vm1, %v4382_v6  ;;  %3766 = vmatmul.mubr.msk.f32.vlgmr.msra.gmra.mxu1 %vm299_vm1, %v4387_v7  ;;  %v3302_v5 = vld [vmem:[%s5362_s3 + $0xc8] sm:$0xff] }
  0x14   : > { %3778 = vmatpush3.msk.msra.mxu0 %vm324_vm0, %v3174_v2  ;;  %3754 = vmatprep.mubr.msk.f32.mxu0 %vm299_vm1, %v4390_v8  ;;  %v4409_v12 = vld [vmem:[%s4377_s14 + $0xc0] sm:$0xff]  ;;  %v4412_v13 = vld [vmem:[%s4377_s14 + $0x30] sm:$0xff] }
  0x15   : > { %3768 = vmatprep.mubr.msk.f32.mxu1 %vm299_vm1, %v4393_v9  ;;  %v4417_v14 = vld [vmem:[%s4377_s14 + $0xd0] sm:$0xff]  ;;  %v4420_v15 = vld [vmem:[%s4377_s14 + $0x40] sm:$0xff]  ;;  %3792 = vmatpush3.msk.msra.mxu1 %vm324_vm0, %v3192_v3 }
  0x16   : > { %3805 = vmatprep.subr.msk.mxu0 %vm324_vm0, %v3210_v10  ;;  %3819 = vmatprep.subr.msk.mxu1 %vm324_vm0, %v3228_v11  ;;  %v4434_v16 = vld [vmem:[%s4377_s14 + $0xe0] sm:$0xff]  ;;  %v4437_v17 = vld [vmem:[%s4377_s14 + $0x50] sm:$0xff] }
  0x17   : > { %3755 = vmatmul.mubr.msk.f32.gmra.mxu0 %vm299_vm1, %v4409_v12  ;;  %3769 = vmatmul.mubr.msk.f32.gmra.mxu1 %vm299_vm1, %v4412_v13  ;;  %v4440_v18 = vld [vmem:[%s4377_s14 + $0xf0] sm:$0xff]  ;;  %v4443_v19 = vld [vmem:[%s4377_s14 + $0x60] sm:$0xff] }
  0x18   : > { %3757 = vmatprep.mubr.msk.f32.mxu0 %vm299_vm1, %v4417_v14  ;;  %3771 = vmatprep.mubr.msk.f32.mxu1 %vm299_vm1, %v4420_v15  ;;  %v4454_v20 = vld [vmem:[%s4377_s14 + $0x100] sm:$0xff]  ;;  %v4457_v21 = vld [vmem:[%s4377_s14 + $0x70] sm:$0xff] }
  0x19   : > { %v565_v22 = vld [vmem:[%s4377_s14 + $0x1] sm:$0xff]  ;;  %v4467_v24 = vld [vmem:[%s4377_s14 + $0x11] sm:$0xff] }
  0x1a   : > { %v3184_v23 = vld [vmem:[%s4377_s14 + $0x120] sm:$0xff]  ;;  %v3185_v25 = vld [vmem:[%s4377_s14 + $0x130] sm:$0xff] }
  0x1b   : > { %3758 = vmatmul.mubr.msk.f32.gmra.mxu0 %vm299_vm1, %v4434_v16  ;;  %3772 = vmatmul.mubr.msk.f32.gmra.mxu1 %vm299_vm1, %v4437_v17  ;;  %v4472_v26 = vld [vmem:[%s4377_s14 + $0x21] sm:$0xff]  ;;  %v4488_v30 = vld [vmem:[%s4377_s14 + $0x31] sm:$0xff] }
  0x1c   : > { %3760 = vmatprep.mubr.msk.f32.mxu0 %vm299_vm1, %v4440_v18  ;;  %3774 = vmatprep.mubr.msk.f32.mxu1 %vm299_vm1, %v4443_v19  ;;  %v3186_v27 = vld [vmem:[%s4377_s14 + $0x140] sm:$0xff]  ;;  %v3187_v31 = vld [vmem:[%s4377_s14 + $0x150] sm:$0xff] }
  0x1d   : > { %v4493_v32 = vld [vmem:[%s4377_s14 + $0x41] sm:$0xff]  ;;  %v4505_v34 = vld [vmem:[%s4377_s14 + $0x51] sm:$0xff] }
  0x1e   : > { %v3188_v33 = vld [vmem:[%s4377_s14 + $0x160] sm:$0xff]  ;;  %v3189_v35 = vld [vmem:[%s4377_s14 + $0x170] sm:$0xff] }
  0x1f   : > { %3761 = vmatmul.mubr.msk.f32.gmra.mxu0 %vm299_vm1, %v4454_v20  ;;  %3775 = vmatmul.mubr.msk.f32.gmra.mxu1 %vm299_vm1, %v4457_v21  ;;  %v4510_v36 = vld [vmem:[%s4377_s14 + $0x61] sm:$0xff]  ;;  %v4519_v38 = vld [vmem:[%s4377_s14 + $0x71] sm:$0xff] }
  0x20   : > { %3779 = vmatprep.mubr.msk.f32.mxu0 %vm299_vm1, %v565_v22  ;;  %3793 = vmatprep.mubr.msk.f32.mxu1 %vm299_vm1, %v3184_v23  ;;  %v3190_v37 = vld [vmem:[%s4377_s14 + $0x180] sm:$0xff]  ;;  %v3191_v39 = vld [vmem:[%s4377_s14 + $0x190] sm:$0xff]  ;;  %v3294_v22 = vld [vmem:[%s5362_s3 + $0x88] sm:$0xff] }
  0x21   : > { %v3202_v40 = vld [vmem:[%s4377_s14 + $0x1b0] sm:$0xff]  ;;  %v3220_v41 = vld [vmem:[%s4377_s14 + $0x121] sm:$0xff] }
  0x22   : > { %v3203_v42 = vld [vmem:[%s4377_s14 + $0x1c0] sm:$0xff]  ;;  %v3221_v43 = vld [vmem:[%s4377_s14 + $0x131] sm:$0xff] }
  0x23   : > { %3780 = vmatmul.mubr.msk.f32.vlgmr.msra.gmra.mxu0 %vm299_vm1, %v4467_v24  ;;  %3794 = vmatmul.mubr.msk.f32.vlgmr.msra.gmra.mxu1 %vm299_vm1, %v3185_v25  ;;  %v3204_v44 = vld [vmem:[%s4377_s14 + $0x1d0] sm:$0xff]  ;;  %v3222_v45 = vld [vmem:[%s4377_s14 + $0x141] sm:$0xff]  ;;  %v1682_v25 = vld [vmem:[%s5362_s3 + $0x18] sm:$0xff] }
  0x24   : > { %3806 = vmatpush3.msk.msra.mxu0 %vm324_vm0, %v3210_v10  ;;  %3782 = vmatprep.mubr.msk.f32.mxu0 %vm299_vm1, %v4472_v26  ;;  %v3205_v47 = vld [vmem:[%s4377_s14 + $0x1e0] sm:$0xff]  ;;  %v3223_v48 = vld [vmem:[%s4377_s14 + $0x151] sm:$0xff] }
  0x25   : > { %3796 = vmatprep.mubr.msk.f32.mxu1 %vm299_vm1, %v3186_v27  ;;  %3820 = vmatpush3.msk.msra.mxu1 %vm324_vm0, %v3228_v11  ;;  %v3206_v49 = vld [vmem:[%s4377_s14 + $0x1f0] sm:$0xff]  ;;  %v3224_v50 = vld [vmem:[%s4377_s14 + $0x161] sm:$0xff]  ;;  %v4703_v27 = vld [vmem:[%s5362_s3 + $0x178] sm:$0xff] }
  0x26   : > { %3833 = vmatprep.subr.msk.mxu0 %vm324_vm0, %v3246_v28  ;;  %3847 = vmatprep.subr.msk.mxu1 %vm324_vm0, %v3264_v29  ;;  %v3207_v51 = vld [vmem:[%s4377_s14 + $0x200] sm:$0xff]  ;;  %v3225_v52 = vld [vmem:[%s4377_s14 + $0x171] sm:$0xff]  ;;  %5369 = vst [vmem:[#allocation3_spill] sm:$0xff] %v4703_v27 }
  0x27   : > { %3783 = vmatmul.mubr.msk.f32.gmra.mxu0 %vm299_vm1, %v4488_v30  ;;  %3797 = vmatmul.mubr.msk.f32.gmra.mxu1 %vm299_vm1, %v3187_v31  ;;  %v3208_v53 = vld [vmem:[%s4377_s14 + $0x210] sm:$0xff]  ;;  %v3226_v54 = vld [vmem:[%s4377_s14 + $0x181] sm:$0xff]  ;;  %v4718_v31 = vld [vmem:[%s5362_s3 + $0x1f8] sm:$0xff] }
  0x28   : > { %3785 = vmatprep.mubr.msk.f32.mxu0 %vm299_vm1, %v4493_v32  ;;  %3799 = vmatprep.mubr.msk.f32.mxu1 %vm299_vm1, %v3188_v33  ;;  %v3209_v55 = vld [vmem:[%s4377_s14 + $0x220] sm:$0xff]  ;;  %v3227_v56 = vld [vmem:[%s4377_s14 + $0x191] sm:$0xff]  ;;  %5370 = vst [vmem:[#allocation4_spill] sm:$0xff] %v4718_v31 }
  0x29   : > { %v3245_v57 = vld [vmem:[%s4377_s14 + $0x80] sm:$0xff]  ;;  %v3263_v58 = vld [vmem:[%s4377_s14 + $0x110] sm:$0xff] }
  0x2a   : > { %v3281_v59 = vld [vmem:[%s4377_s14 + $0x81] sm:$0xff]  ;;  %v1693_v2 = vld [vmem:[%s5362_s3 + $0x70] sm:$0xff] }
  0x2b   : > { %3786 = vmatmul.mubr.msk.f32.gmra.mxu0 %vm299_vm1, %v4505_v34  ;;  %3800 = vmatmul.mubr.msk.f32.gmra.mxu1 %vm299_vm1, %v3189_v35  ;;  %v3303_v3 = vld [vmem:[%s5362_s3 + $0xd0] sm:$0xff]  ;;  %v1683_v23 = vld [vmem:[%s5362_s3 + $0x20] sm:$0xff] }
  0x2c   : > { %3788 = vmatprep.mubr.msk.f32.mxu0 %vm299_vm1, %v4510_v36  ;;  %3802 = vmatprep.mubr.msk.f32.mxu1 %vm299_vm1, %v3190_v37  ;;  %v1689_v10 = vld [vmem:[%s5362_s3 + $0x50] sm:$0xff] }
  0x2d   : > { %v3299_v11 = vld [vmem:[%s5362_s3 + $0xb0] sm:$0xff] }
  0x2f   : > { %3789 = vmatmul.mubr.msk.f32.gmra.mxu0 %vm299_vm1, %v4519_v38  ;;  %3803 = vmatmul.mubr.msk.f32.gmra.mxu1 %vm299_vm1, %v3191_v39 }
  0x30   : > { %3807 = vmatprep.mubr.msk.f32.mxu0 %vm299_vm1, %v3202_v40  ;;  %3821 = vmatprep.mubr.msk.f32.mxu1 %vm299_vm1, %v3220_v41 }
  0x33   : > { %3808 = vmatmul.mubr.msk.f32.vlgmr.msra.gmra.mxu0 %vm299_vm1, %v3203_v42  ;;  %3822 = vmatmul.mubr.msk.f32.vlgmr.msra.gmra.mxu1 %vm299_vm1, %v3221_v43 }
  0x34   : > { %3834 = vmatpush3.msk.msra.mxu0 %vm324_vm0, %v3246_v28  ;;  %3810 = vmatprep.mubr.msk.f32.mxu0 %vm299_vm1, %v3204_v44  ;;  %v1681_v28 = vld [vmem:[%s5362_s3 + $0x10] sm:$0xff] }
  0x35   : > { %3824 = vmatprep.mubr.msk.f32.mxu1 %vm299_vm1, %v3222_v45  ;;  %3848 = vmatpush3.msk.msra.mxu1 %vm324_vm0, %v3264_v29  ;;  %v1680_v29 = vld [vmem:[%s5362_s3 + $0x8] sm:$0xff] }
  0x36   : > { %3861 = vmatprep.subr.msk.mxu0 %vm324_vm0, %v3282_v46  ;;  %3875 = vmatprep.subr.mxu1 %v3308_v60 }
  0x37   : > { %3811 = vmatmul.mubr.msk.f32.gmra.mxu0 %vm299_vm1, %v3205_v47  ;;  %3825 = vmatmul.mubr.msk.f32.gmra.mxu1 %vm299_vm1, %v3223_v48 }
  0x38   : > { %3813 = vmatprep.mubr.msk.f32.mxu0 %vm299_vm1, %v3206_v49  ;;  %3827 = vmatprep.mubr.msk.f32.mxu1 %vm299_vm1, %v3224_v50 }
  0x3b   : > { %3814 = vmatmul.mubr.msk.f32.gmra.mxu0 %vm299_vm1, %v3207_v51  ;;  %3828 = vmatmul.mubr.msk.f32.gmra.mxu1 %vm299_vm1, %v3225_v52 }
  0x3c   : > { %3816 = vmatprep.mubr.msk.f32.mxu0 %vm299_vm1, %v3208_v53  ;;  %3830 = vmatprep.mubr.msk.f32.mxu1 %vm299_vm1, %v3226_v54 }
  0x3f   : > { %3817 = vmatmul.mubr.msk.f32.gmra.mxu0 %vm299_vm1, %v3209_v55  ;;  %3831 = vmatmul.mubr.msk.f32.gmra.mxu1 %vm299_vm1, %v3227_v56 }
  0x40   : > { %3835 = vmatprep.mubr.msk.f32.mxu0 %vm299_vm1, %v4387_v7  ;;  %3849 = vmatprep.mubr.msk.f32.mxu1 %vm299_vm1, %v4382_v6  ;;  %v1691_v6 = vld [vmem:[%s5362_s3 + $0x60] sm:$0xff] }
  0x41   : > { %v3301_v7 = vld [vmem:[%s5362_s3 + $0xc0] sm:$0xff] }
  0x43   : > { %3836 = vmatmul.mubr.msk.f32.vlgmr.msra.gmra.mxu0 %vm299_vm1, %v4393_v9  ;;  %3850 = vmatmul.mubr.msk.f32.vlgmr.msra.gmra.mxu1 %vm299_vm1, %v4390_v8  ;;  %v1690_v8 = vld [vmem:[%s5362_s3 + $0x58] sm:$0xff] }
  0x44   : > { %3862 = vmatpush3.msk.msra.mxu0 %vm324_vm0, %v3282_v46  ;;  %3838 = vmatprep.mubr.msk.f32.mxu0 %vm299_vm1, %v4412_v13  ;;  %v3300_v9 = vld [vmem:[%s5362_s3 + $0xb8] sm:$0xff]  ;;  %v3298_v13 = vld [vmem:[%s5362_s3 + $0xa8] sm:$0xff] }
  0x45   : > { %3852 = vmatprep.mubr.msk.f32.mxu1 %vm299_vm1, %v4409_v12  ;;  %3876 = vmatpush3.msra.mxu1 %v3308_v60  ;;  %v1688_v12 = vld [vmem:[%s5362_s3 + $0x48] sm:$0xff] }
  0x46   : > { %3877 = vmatprep.subr.mxu1 %v3307_v61  ;;  %3919 = vmatprep.subr.mxu0 %v1694_v0 }
  0x47   : > { %3839 = vmatmul.mubr.msk.f32.gmra.mxu0 %vm299_vm1, %v4420_v15  ;;  %3853 = vmatmul.mubr.msk.f32.gmra.mxu1 %vm299_vm1, %v4417_v14  ;;  %v1687_v14 = vld [vmem:[%s5362_s3 + $0x40] sm:$0xff] }
  0x48   : > { %3841 = vmatprep.mubr.msk.f32.mxu0 %vm299_vm1, %v4437_v17  ;;  %3855 = vmatprep.mubr.msk.f32.mxu1 %vm299_vm1, %v4434_v16  ;;  %v3297_v15 = vld [vmem:[%s5362_s3 + $0xa0] sm:$0xff]  ;;  %v1686_v16 = vld [vmem:[%s5362_s3 + $0x38] sm:$0xff] }
  0x49   : > { %3878 = vmatpush3.msra.mxu1 %v3307_v61  ;;  %v3296_v17 = vld [vmem:[%s5362_s3 + $0x98] sm:$0xff] }
  0x4a   : > { %3879 = vmatprep.subr.mxu1 %v3306_v62 }
  0x4b   : > { %3842 = vmatmul.mubr.msk.f32.gmra.mxu0 %vm299_vm1, %v4443_v19  ;;  %3856 = vmatmul.mubr.msk.f32.gmra.mxu1 %vm299_vm1, %v4440_v18  ;;  %v4304_v18 = vmov 0.0   ;;  %v1685_v19 = vld [vmem:[%s5362_s3 + $0x30] sm:$0xff] }
  0x4c   : > { %3844 = vmatprep.mubr.msk.f32.mxu0 %vm299_vm1, %v4457_v21  ;;  %3858 = vmatprep.mubr.msk.f32.mxu1 %vm299_vm1, %v4454_v20  ;;  %1646 = vst [vmem:[#allocation2 + $0x20] sm:$0xff] %v4304_v18  ;;  %1647 = vst [vmem:[#allocation2 + $0x28] sm:$0x3] %v4304_v18  ;;  %v3295_v20 = vld [vmem:[%s5362_s3 + $0x90] sm:$0xff]  ;;  %v1684_v21 = vld [vmem:[%s5362_s3 + $0x28] sm:$0xff] }
  0x4d   : > { %3880 = vmatpush3.msra.mxu1 %v3306_v62  ;;  %1642 = vst [vmem:[#allocation2] sm:$0xff] %v4304_v18  ;;  %1643 = vst [vmem:[#allocation2 + $0x8] sm:$0x3] %v4304_v18 }
  0x4e   : > { %3881 = vmatprep.subr.mxu1 %v3305_v63  ;;  %1644 = vst [vmem:[#allocation2 + $0x10] sm:$0xff] %v4304_v18  ;;  %1645 = vst [vmem:[#allocation2 + $0x18] sm:$0x3] %v4304_v18 }
  0x4f   : > { %3845 = vmatmul.mubr.msk.f32.gmra.mxu0 %vm299_vm1, %v3245_v57  ;;  %3859 = vmatmul.mubr.msk.f32.gmra.mxu1 %vm299_vm1, %v3263_v58  ;;  %1648 = vst [vmem:[#allocation2 + $0x30] sm:$0xff] %v4304_v18  ;;  %1649 = vst [vmem:[#allocation2 + $0x38] sm:$0x3] %v4304_v18 }
  0x50   : > { %3863 = vmatprep.mubr.msk.f32.mxu0 %vm299_vm1, %v4467_v24  ;;  %3882 = vmatpush3.msra.mxu1 %v3305_v63  ;;  %1650 = vst [vmem:[#allocation2 + $0x40] sm:$0xff] %v4304_v18  ;;  %1651 = vst [vmem:[#allocation2 + $0x48] sm:$0x3] %v4304_v18  ;;  %v3293_v24 = vld [vmem:[%s5362_s3 + $0x80] sm:$0xff] }
  0x51   : > { %3883 = vmatprep.subr.mxu1 %v3304_v1  ;;  %1652 = vst [vmem:[#allocation2 + $0x50] sm:$0xff] %v4304_v18  ;;  %1653 = vst [vmem:[#allocation2 + $0x58] sm:$0x3] %v4304_v18 }
  0x52   : > { %3884 = vmatpush3.msra.mxu1 %v3304_v1  ;;  %1654 = vst [vmem:[#allocation2 + $0x60] sm:$0xff] %v4304_v18  ;;  %1655 = vst [vmem:[#allocation2 + $0x68] sm:$0x3] %v4304_v18 }
  0x53   : > { %3864 = vmatmul.mubr.msk.f32.vlgmr.msra.gmra.mxu0 %vm299_vm1, %v4472_v26  ;;  %3885 = vmatprep.subr.mxu1 %v3303_v3  ;;  %1656 = vst [vmem:[#allocation2 + $0x70] sm:$0xff] %v4304_v18  ;;  %1657 = vst [vmem:[#allocation2 + $0x78] sm:$0x3] %v4304_v18 }
  0x54   : > { %3866 = vmatprep.mubr.msk.f32.mxu0 %vm299_vm1, %v4488_v30  ;;  %3920 = vmatpush3.msra.mxu0 %v1694_v0  ;;  %1658 = vst [vmem:[#allocation2 + $0x80] sm:$0xff] %v4304_v18  ;;  %1659 = vst [vmem:[#allocation2 + $0x88] sm:$0x3] %v4304_v18  ;;  %v1695_v26 = vld [vmem:[#allocation2 + $0x1] sm:$0xff] }
  0x55   : > { %3921 = vmatprep.subr.mxu0 %v1693_v2  ;;  %3886 = vmatpush3.msra.mxu1 %v3303_v3  ;;  %1660 = vst [vmem:[#allocation2 + $0x90] sm:$0xff] %v4304_v18  ;;  %1661 = vst [vmem:[#allocation2 + $0x98] sm:$0x3] %v4304_v18  ;;  %v1679_v30 = vld [vmem:[%s5362_s3] sm:$0xff] }
  0x56   : > { %3922 = vmatpush3.msra.mxu0 %v1693_v2  ;;  %3887 = vmatprep.subr.mxu1 %v3302_v5 }
  0x57   : > { %3867 = vmatmul.mubr.msk.f32.gmra.mxu0 %vm299_vm1, %v4493_v32  ;;  %3923 = vmatprep.subr.mxu0 %v1692_v4 }
  0x58   : > { %3869 = vmatprep.mubr.msk.f32.mxu0 %vm299_vm1, %v4505_v34  ;;  %3924 = vmatpush3.msra.mxu0 %v1692_v4 }
  0x59   : > { %3888 = vmatpush3.msra.mxu1 %v3302_v5  ;;  %3925 = vmatprep.subr.mxu0 %v1691_v6 }
  0x5a   : > { %3889 = vmatprep.subr.mxu1 %v3301_v7  ;;  %3926 = vmatpush3.msra.mxu0 %v1691_v6 }
  0x5b   : > { %3870 = vmatmul.mubr.msk.f32.gmra.mxu0 %vm299_vm1, %v4510_v36  ;;  %3890 = vmatpush3.msra.mxu1 %v3301_v7 }
  0x5c   : > { %3872 = vmatprep.mubr.msk.f32.mxu0 %vm299_vm1, %v4519_v38  ;;  %3927 = vmatprep.subr.mxu0 %v1690_v8 }
  0x5d   : > { %3891 = vmatprep.subr.mxu1 %v3300_v9  ;;  %3928 = vmatpush3.msra.mxu0 %v1690_v8 }
  0x5e   : > { %3892 = vmatpush3.msra.mxu1 %v3300_v9  ;;  %3929 = vmatprep.subr.mxu0 %v1689_v10 }
  0x5f   : > { %3873 = vmatmul.mubr.msk.f32.gmra.mxu0 %vm299_vm1, %v3281_v59  ;;  %3893 = vmatprep.subr.mxu1 %v3299_v11 }
  0x60   : > { %3930 = vmatpush3.msra.mxu0 %v1689_v10  ;;  %3894 = vmatpush3.msra.mxu1 %v3299_v11 }
  0x61   : > { %3931 = vmatprep.subr.mxu0 %v1688_v12  ;;  %3895 = vmatprep.subr.mxu1 %v3298_v13 }
  0x62   : > { %3932 = vmatpush3.msra.mxu0 %v1688_v12  ;;  %3896 = vmatpush3.msra.mxu1 %v3298_v13 }
  0x63   : > { %3933 = vmatprep.subr.mxu0 %v1687_v14  ;;  %3897 = vmatprep.subr.mxu1 %v3297_v15 }
  0x64   : > { %3934 = vmatpush3.msra.mxu0 %v1687_v14  ;;  %3898 = vmatpush3.msra.mxu1 %v3297_v15 }
  0x65   : > { %3935 = vmatprep.subr.mxu0 %v1686_v16  ;;  %3899 = vmatprep.subr.mxu1 %v3296_v17 }
  0x66   : > { %3936 = vmatpush3.msra.mxu0 %v1686_v16  ;;  %3900 = vmatpush3.msra.mxu1 %v3296_v17 }
  0x67   : > { %3937 = vmatprep.subr.mxu0 %v1685_v19  ;;  %3901 = vmatprep.subr.mxu1 %v3295_v20 }
  0x68   : > { %3938 = vmatpush3.msra.mxu0 %v1685_v19  ;;  %3902 = vmatpush3.msra.mxu1 %v3295_v20 }
  0x69   : > { %3939 = vmatprep.subr.mxu0 %v1684_v21  ;;  %3903 = vmatprep.subr.mxu1 %v3294_v22 }
  0x6a   : > { %3940 = vmatpush3.msra.mxu0 %v1684_v21  ;;  %3904 = vmatpush3.msra.mxu1 %v3294_v22 }
  0x6b   : > { %3941 = vmatprep.subr.mxu0 %v1683_v23  ;;  %3905 = vmatprep.subr.mxu1 %v3293_v24 }
  0x6c   : > { %3942 = vmatpush3.msra.mxu0 %v1683_v23  ;;  %3906 = vmatpush3.msra.mxu1 %v3293_v24 }
  0x6d   : > { %3943 = vmatprep.subr.mxu0 %v1682_v25  ;;  %3907 = vmatprep.mubr.f32.mxu1 %v1695_v26 }
  0x6e   : > { %3944 = vmatpush3.msra.mxu0 %v1682_v25  ;;  %3951 = vmatprep.mubr.f32.mxu0 %v4304_v18 }
  0x6f   : > { %3945 = vmatprep.subr.mxu0 %v1681_v28  ;;  %3963 = vmatprep.subr.mxu1 %v4703_v27 }
  0x70   : > { %3946 = vmatpush3.msra.mxu0 %v1681_v28 }
  0x71   : > { %3947 = vmatprep.subr.mxu0 %v1680_v29 }
  0x72   : > { %3948 = vmatpush3.msra.mxu0 %v1680_v29 }
  0x73   : > { %3949 = vmatprep.subr.mxu0 %v1679_v30 }
  0x74   : > { %3950 = vmatpush3.msra.mxu0 %v1679_v30 }
  0x75   : > { %4007 = vmatprep.subr.mxu0 %v4718_v31 }
  0xd3   : > { %v3753_v32 = vpop.f32.mrf.mxu0  ;;  %v3767_v33 = vpop.f32.mrf.mxu1 }
  0xd4   : > { %v532_v14 = vadd.f32 %v3767_v33, %v3753_v32 }
  0xd5   : > { %v394_v34 = vpop.f32.mrf.mxu0  ;;  %v526_v35 = vpop.f32.mrf.mxu1 }
  0xd6   : > { %v527_v17 = vadd.f32 %v526_v35, %v394_v34 }
  0xd7   : > { %v3756_v36 = vpop.f32.mrf.mxu0  ;;  %v3770_v37 = vpop.f32.mrf.mxu1 }
  0xd8   : > { %v542_v21 = vadd.f32 %v3770_v37, %v3756_v36 }
  0xd9   : > { %v404_v38 = vpop.f32.mrf.mxu0  ;;  %v536_v39 = vpop.f32.mrf.mxu1 }
  0xda   : > { %v537_v25 = vadd.f32 %v536_v39, %v404_v38 }
  0xdb   : > { %v3759_v40 = vpop.f32.mrf.mxu0  ;;  %v3773_v41 = vpop.f32.mrf.mxu1 }
  0xdc   : > { %v552_v29 = vadd.f32 %v3773_v41, %v3759_v40 }
  0xdd   : > { %v414_v42 = vpop.f32.mrf.mxu0  ;;  %v546_v43 = vpop.f32.mrf.mxu1 }
  0xde   : > { %v547_v32 = vadd.f32 %v546_v43, %v414_v42 }
  0xdf   : > { %v3762_v44 = vpop.f32.mrf.mxu0  ;;  %v3776_v45 = vpop.f32.mrf.mxu1 }
  0xe1   : > { %v4721_v46 = vpop.f32.mrf.mxu0  ;;  %v556_v47 = vpop.f32.mrf.mxu1 }
  0xe2   : > { %v557_v38 = vadd.f32 %v556_v47, %v4721_v46 }
  0xe3   : > { %v3781_v48 = vpop.f32.mrf.mxu0  ;;  %v3795_v49 = vpop.f32.mrf.mxu1 }
  0xe4   : > { %v708_v18 = vadd.f32 %v3781_v48, %v532_v14  ;;  %v562_v48 = vadd.f32 %v3776_v45, %v3762_v44 }
  0xe5   : > { %v668_v50 = vpop.f32.mrf.mxu0  ;;  %v819_v51 = vpop.f32.mrf.mxu1 }
  0xe6   : > { %v707_v22 = vadd.f32 %v668_v50, %v527_v17  ;;  %v859_v26 = vadd.f32 %v3795_v49, %v708_v18 }
  0xe7   : > { %v3784_v52 = vpop.f32.mrf.mxu0  ;;  %v3798_v53 = vpop.f32.mrf.mxu1 }
  0xe8   : > { %v710_v28 = vadd.f32 %v3784_v52, %v542_v21  ;;  %v858_v31 = vadd.f32 %v819_v51, %v707_v22 }
  0xe9   : > { %v678_v54 = vpop.f32.mrf.mxu0  ;;  %v829_v55 = vpop.f32.mrf.mxu1 }
  0xea   : > { %v709_v27 = vadd.f32 %v678_v54, %v537_v25  ;;  %v861_v34 = vadd.f32 %v3798_v53, %v710_v28 }
  0xeb   : > { %v3787_v56 = vpop.f32.mrf.mxu0  ;;  %v3801_v57 = vpop.f32.mrf.mxu1 }
  0xec   : > { %v712_v33 = vadd.f32 %v3787_v56, %v552_v29  ;;  %v860_v37 = vadd.f32 %v829_v55, %v709_v27 }
  0xed   : > { %v688_v58 = vpop.f32.mrf.mxu0  ;;  %v839_v59 = vpop.f32.mrf.mxu1 }
  0xee   : > { %v711_v14 = vadd.f32 %v688_v58, %v547_v32  ;;  %v863_v39 = vadd.f32 %v3801_v57, %v712_v33 }
  0xef   : > { %v3790_v60 = vpop.f32.mrf.mxu0  ;;  %v3804_v61 = vpop.f32.mrf.mxu1 }
  0xf0   : > { %v714_v40 = vadd.f32 %v3790_v60, %v562_v48  ;;  %v862_v43 = vadd.f32 %v839_v59, %v711_v14  ;;  %v4736_v59 = vld [vmem:[%s5361_s2] ss:$0 sm:$0xff] }
  0xf1   : > { %v698_v62 = vpop.f32.mrf.mxu0  ;;  %v4723_v63 = vpop.f32.mrf.mxu1 }
  0xf2   : > { %v713_v54 = vadd.f32 %v698_v62, %v557_v38  ;;  %v865_v45 = vadd.f32 %v3804_v61, %v714_v40  ;;  %v5377_v38 = vld [vmem:[#allocation3_spill] sm:$0xff] }
  0xf3   : > { %v3809_v0 = vpop.f32.mrf.mxu0  ;;  %v3823_v1 = vpop.f32.mrf.mxu1 }
  0xf4   : > { %v864_v47 = vadd.f32 %v4723_v63, %v713_v54 }
  0xf5   : > { %v970_v2 = vpop.f32.mrf.mxu0  ;;  %v1120_v3 = vpop.f32.mrf.mxu1 }
  0xf6   : > { %v1009_v35 = vadd.f32 %v970_v2, %v858_v31 }
  0xf7   : > { %v3812_v4 = vpop.f32.mrf.mxu0  ;;  %v3826_v5 = vpop.f32.mrf.mxu1 }
  0xf8   : > { %v1012_v17 = vadd.f32 %v3812_v4, %v861_v34  ;;  %v1159_v51 = vadd.f32 %v1120_v3, %v1009_v35  ;;  %v3323_v35 = vld [vmem:[%s5362_s3 + $0x170] sm:$0xff] }
  0xf9   : > { %v980_v6 = vpop.f32.mrf.mxu0  ;;  %v1130_v7 = vpop.f32.mrf.mxu1 }
  0xfa   : > { %v1011_v52 = vadd.f32 %v980_v6, %v860_v37  ;;  %v1162_v31 = vadd.f32 %v3826_v5, %v1012_v17 }
  0xfb   : > { %v3815_v8 = vpop.f32.mrf.mxu0  ;;  %v3829_v9 = vpop.f32.mrf.mxu1 }
  0xfc   : > { %v1014_v56 = vadd.f32 %v3815_v8, %v863_v39  ;;  %v3322_v39 = vld [vmem:[%s5362_s3 + $0x168] sm:$0xff] }
  0xfd   : > { %v990_v10 = vpop.f32.mrf.mxu0  ;;  %v4725_v11 = vpop.f32.mrf.mxu1 }
  0xfe   : > { %5371 = vst [vmem:[#allocation5_spill] sm:$0xff] %v4725_v11  ;;  %v1013_v58 = vadd.f32 %v990_v10, %v862_v43  ;;  %v1164_v57 = vadd.f32 %v3829_v9, %v1014_v56 }
  0xff   : > { %v3818_v12 = vpop.f32.mrf.mxu0  ;;  %v4727_v13 = vpop.f32.mrf.mxu1 }
 0x100   : > { %5372 = vst [vmem:[#allocation6_spill] sm:$0xff] %v4727_v13  ;;  %v1010_v13 = vadd.f32 %v3809_v0, %v859_v26  ;;  %v1161_v0 = vadd.f32 %v1130_v7, %v1011_v52  ;;  %v1016_v60 = vadd.f32 %v3818_v12, %v865_v45 }
 0x101   : > { %v1000_v15 = vpop.f32.mrf.mxu0  ;;  %v4729_v16 = vpop.f32.mrf.mxu1 }
 0x102   : > { %5373 = vst [vmem:[#allocation7_spill] sm:$0xff] %v4729_v16  ;;  %v1160_v50 = vadd.f32 %v3823_v1, %v1010_v13  ;;  %v1015_v6 = vadd.f32 %v1000_v15, %v864_v47 }
 0x103   : > { %v3837_v19 = vpop.f32.mrf.mxu0  ;;  %v3851_v20 = vpop.f32.mrf.mxu1 }
 0x104   : > { %v1311_v42 = vadd.f32 %v3837_v19, %v1160_v50 }
 0x105   : > { %v1271_v23 = vpop.f32.mrf.mxu0  ;;  %v1422_v24 = vpop.f32.mrf.mxu1  ;;  %v5374_v61 = vld [vmem:[#allocation5_spill] sm:$0xff] }
 0x106   : > { %v1310_v44 = vadd.f32 %v1271_v23, %v1159_v51  ;;  %v1462_v1 = vadd.f32 %v3851_v20, %v1311_v42  ;;  %v1163_v5 = vadd.f32 %v5374_v61, %v1013_v58  ;;  %v3321_v42 = vld [vmem:[%s5362_s3 + $0x160] sm:$0xff]  ;;  %v3336_v61 = vld [vmem:[%s5362_s3 + $0x1d8] sm:$0xff] }
 0x107   : > { %v3840_v30 = vpop.f32.mrf.mxu0  ;;  %v3854_v16 = vpop.f32.mrf.mxu1  ;;  %v5375_v12 = vld [vmem:[#allocation6_spill] sm:$0xff] }
 0x108   : > { %v1313_v46 = vadd.f32 %v3840_v30, %v1162_v31  ;;  %v1461_v62 = vadd.f32 %v1422_v24, %v1310_v44  ;;  %v1166_v18 = vadd.f32 %v5375_v12, %v1016_v60  ;;  %v3320_v44 = vld [vmem:[%s5362_s3 + $0x158] sm:$0xff]  ;;  %v3338_v60 = vld [vmem:[%s5362_s3 + $0x1e8] sm:$0xff] }
 0x109   : > { %v1281_v11 = vpop.f32.mrf.mxu0  ;;  %v1432_v41 = vpop.f32.mrf.mxu1  ;;  %v5376_v24 = vld [vmem:[#allocation7_spill] sm:$0xff]  ;;  %v3316_v12 = vld [vmem:[%s5362_s3 + $0x138] sm:$0xff] }
 0x10a   : > { %v1312_v3 = vadd.f32 %v1281_v11, %v1161_v0  ;;  %v1464_v13 = vadd.f32 %v3854_v16, %v1313_v46  ;;  %v1165_v25 = vadd.f32 %v5376_v24, %v1015_v6  ;;  %v3339_v0 = vld [vmem:[%s5362_s3 + $0x1f0] sm:$0xff]  ;;  %v3329_v24 = vld [vmem:[%s5362_s3 + $0x1a0] sm:$0xff] }
 0x10b   : > { %v3843_v36 = vpop.f32.mrf.mxu0  ;;  %v3857_v27 = vpop.f32.mrf.mxu1  ;;  %v3335_v6 = vld [vmem:[%s5362_s3 + $0x1d0] sm:$0xff] }
 0x10c   : > { %v1315_v8 = vadd.f32 %v3843_v36, %v1164_v57  ;;  %v1463_v21 = vadd.f32 %v1432_v41, %v1312_v3  ;;  %v5378_v57 = vld [vmem:[#allocation4_spill] sm:$0xff] }
 0x10d   : > { %v1291_v49 = vpop.f32.mrf.mxu0  ;;  %v1442_v7 = vpop.f32.mrf.mxu1 }
 0x10e   : > { %v1314_v19 = vadd.f32 %v1291_v49, %v1163_v5  ;;  %v1466_v15 = vadd.f32 %v3857_v27, %v1315_v8 }
 0x10f   : > { %v3846_v53 = vpop.f32.mrf.mxu0  ;;  %v3860_v26 = vpop.f32.mrf.mxu1 }
 0x110   : > { %v1317_v29 = vadd.f32 %v3846_v53, %v1166_v18  ;;  %v1465_v33 = vadd.f32 %v1442_v7, %v1314_v19  ;;  %v3318_v7 = vld [vmem:[%s5362_s3 + $0x148] sm:$0xff]  ;;  %v3332_v18 = vld [vmem:[%s5362_s3 + $0x1b8] sm:$0xff]  ;;  %v3315_v19 = vld [vmem:[%s5362_s3 + $0x130] sm:$0xff] }
 0x111   : > { %v1301_v55 = vpop.f32.mrf.mxu0  ;;  %v1452_v50 = vpop.f32.mrf.mxu1 }
 0x112   : > { %v1316_v48 = vadd.f32 %v1301_v55, %v1165_v25  ;;  %v1468_v40 = vadd.f32 %v3860_v26, %v1317_v29  ;;  %v3312_v25 = vld [vmem:[%s5362_s3 + $0x118] sm:$0xff]  ;;  %v3311_v26 = vld [vmem:[%s5362_s3 + $0x110] sm:$0xff]  ;;  %v3310_v29 = vld [vmem:[%s5362_s3 + $0x108] sm:$0xff] }
 0x113   : > { %v3865_v2 = vpop.f32.mrf.mxu0 }
 0x114   : > { %v1612_v4 = vadd.f32 %v3865_v2, %v1462_v1  ;;  %v1467_v43 = vadd.f32 %v1452_v50, %v1316_v48  ;;  %v3355_v50 = vld [vmem:[%s5362_s3 + $0x270] sm:$0xff] }
 0x115   : > { %v1572_v10 = vpop.f32.mrf.mxu0 }
 0x116   : > { %v1627_v63 = vadd.f32 %v4736_v59, %v1612_v4  ;;  %v1611_v9 = vadd.f32 %v1572_v10, %v1461_v62  ;;  %v3337_v62 = vld [vmem:[%s5362_s3 + $0x1e0] sm:$0xff]  ;;  %v3319_v4 = vld [vmem:[%s5362_s3 + $0x150] sm:$0xff]  ;;  %v3334_v10 = vld [vmem:[%s5362_s3 + $0x1c8] sm:$0xff] }
 0x117   : > { %v3868_v20 = vpop.f32.mrf.mxu0 }
 0x118   : > { %v4741_v22 = vmax.f32 %v1627_v63, 0.0  ;;  %v1626_v11 = vadd.f32 %v4736_v59, %v1611_v9  ;;  %v1614_v23 = vadd.f32 %v3868_v20, %v1464_v13  ;;  %v3317_v63 = vld [vmem:[%s5362_s3 + $0x140] sm:$0xff]  ;;  %v3331_v20 = vld [vmem:[%s5362_s3 + $0x1b0] sm:$0xff] }
 0x119   : > { %v1582_v28 = vpop.f32.mrf.mxu0  ;;  %v3333_v9 = vld [vmem:[%s5362_s3 + $0x1c0] sm:$0xff] }
 0x11a   : > { %1664 = vst [vmem:[#allocation2 + $0x21] sm:$0xff] %v4741_v22  ;;  %v4746_v16 = vmax.f32 %v1626_v11, 0.0  ;;  %v1629_v30 = vadd.f32 %v4736_v59, %v1614_v23  ;;  %v1613_v32 = vadd.f32 %v1582_v28, %v1463_v21  ;;  %v3314_v21 = vld [vmem:[%s5362_s3 + $0x128] sm:$0xff]  ;;  %v3313_v23 = vld [vmem:[%s5362_s3 + $0x120] sm:$0xff]  ;;  %v3327_v28 = vld [vmem:[%s5362_s3 + $0x190] sm:$0xff] }
 0x11b   : > { %v3871_v34 = vpop.f32.mrf.mxu0  ;;  %v3330_v11 = vld [vmem:[%s5362_s3 + $0x1a8] sm:$0xff] }
 0x11c   : > { %1663 = vst [vmem:[#allocation2 + $0x11] sm:$0xff] %v4746_v16  ;;  %v4753_v14 = vmax.f32 %v1629_v30, 0.0  ;;  %v1628_v36 = vadd.f32 %v4736_v59, %v1613_v32  ;;  %v1616_v37 = vadd.f32 %v3871_v34, %v1466_v15  ;;  %3908 = vmatmul.mubr.f32.vlgmr.msra.gmra.mxu1 %v4746_v16  ;;  %v3328_v15 = vld [vmem:[%s5362_s3 + $0x198] sm:$0xff]  ;;  %v3326_v30 = vld [vmem:[%s5362_s3 + $0x188] sm:$0xff]  ;;  %v3309_v32 = vld [vmem:[%s5362_s3 + $0x100] sm:$0xff] }
 0x11d   : > { %v1592_v17 = vpop.f32.mrf.mxu0  ;;  %3964 = vmatpush3.msra.mxu1 %v5377_v38  ;;  %3910 = vmatprep.mubr.f32.mxu1 %v4741_v22  ;;  %v1930_v34 = vld [vmem:[#allocation2 + $0x2] sm:$0xff] }
 0x11e   : > { %1666 = vst [vmem:[#allocation2 + $0x41] sm:$0xff] %v4753_v14  ;;  %v4763_v41 = vmax.f32 %v1628_v36, 0.0  ;;  %v1631_v49 = vadd.f32 %v4736_v59, %v1616_v37  ;;  %v1615_v51 = vadd.f32 %v1592_v17, %v1465_v33  ;;  %3965 = vmatprep.subr.mxu1 %v3323_v35  ;;  %v3325_v33 = vld [vmem:[%s5362_s3 + $0x180] sm:$0xff]  ;;  %v3372_v36 = vld [vmem:[%s5362_s3 + $0x2f8] sm:$0xff]  ;;  %v3371_v17 = vld [vmem:[%s5362_s3 + $0x2f0] sm:$0xff] }
 0x11f   : > { %v3874_v52 = vpop.f32.mrf.mxu0  ;;  %3966 = vmatpush3.msra.mxu1 %v3323_v35  ;;  %v3356_v35 = vld [vmem:[%s5362_s3 + $0x278] sm:$0xff]  ;;  %v3354_v38 = vld [vmem:[%s5362_s3 + $0x268] sm:$0xff] }
 0x120   : > { %1665 = vst [vmem:[#allocation2 + $0x31] sm:$0xff] %v4763_v41  ;;  %v4770_v54 = vmax.f32 %v1631_v49, 0.0  ;;  %v1630_v56 = vadd.f32 %v4736_v59, %v1615_v51  ;;  %v1618_v53 = vadd.f32 %v3874_v52, %v1468_v40  ;;  %3967 = vmatprep.subr.mxu1 %v3322_v39  ;;  %3911 = vmatmul.mubr.f32.gmra.mxu1 %v4763_v41  ;;  %v3370_v40 = vld [vmem:[%s5362_s3 + $0x2e8] sm:$0xff]  ;;  %v3353_v51 = vld [vmem:[%s5362_s3 + $0x260] sm:$0xff] }
 0x121   : > { %v1602_v31 = vpop.f32.mrf.mxu0  ;;  %3968 = vmatpush3.msra.mxu1 %v3322_v39  ;;  %3913 = vmatprep.mubr.f32.mxu1 %v4753_v14  ;;  %v4789_v47 = vld [vmem:[#allocation2 + $0x20] sm:$0xff] }
 0x122   : > { %1668 = vst [vmem:[#allocation2 + $0x61] sm:$0xff] %v4770_v54  ;;  %v4779_v45 = vmax.f32 %v1630_v56, 0.0  ;;  %v1633_v58 = vadd.f32 %v4736_v59, %v1618_v53  ;;  %v1617_v27 = vadd.f32 %v1602_v31, %v1467_v43  ;;  %3969 = vmatprep.subr.mxu1 %v3321_v42  ;;  %v4900_v37 = vld [vmem:[#allocation2 + $0x22] sm:$0xff]  ;;  %v3368_v56 = vld [vmem:[%s5362_s3 + $0x2d8] sm:$0xff]  ;;  %v3351_v31 = vld [vmem:[%s5362_s3 + $0x250] sm:$0xff] }
 0x123   : > { %v1672_v55 = vld [vmem:[#allocation2 + $0x10] sm:$0xff]  ;;  %3970 = vmatpush3.msra.mxu1 %v3321_v42  ;;  %v3369_v52 = vld [vmem:[%s5362_s3 + $0x2e0] sm:$0xff]  ;;  %v3352_v42 = vld [vmem:[%s5362_s3 + $0x258] sm:$0xff] }
 0x124   : > { %1667 = vst [vmem:[#allocation2 + $0x51] sm:$0xff] %v4779_v45  ;;  %v4786_v1 = vmax.f32 %v1633_v58, 0.0  ;;  %v1632_v46 = vadd.f32 %v4736_v59, %v1617_v27  ;;  %3952 = vmatmul.mubr.f32.vlgmr.msra.gmra.mxu0 %v1672_v55  ;;  %3971 = vmatprep.subr.mxu1 %v3320_v44  ;;  %v4893_v48 = vld [vmem:[#allocation2 + $0x12] sm:$0xff]  ;;  %v3350_v58 = vld [vmem:[%s5362_s3 + $0x248] sm:$0xff] }
 0x125   : > { %4008 = vmatpush3.msra.mxu0 %v5378_v57  ;;  %3954 = vmatprep.mubr.f32.mxu0 %v4789_v47  ;;  %v4807_v3 = vld [vmem:[#allocation2 + $0x40] sm:$0xff] }
 0x126   : > { %1670 = vst [vmem:[#allocation2 + $0x81] sm:$0xff] %v4786_v1  ;;  %v4797_v2 = vmax.f32 %v1632_v46, 0.0  ;;  %4009 = vmatprep.subr.mxu0 %v3339_v0  ;;  %3914 = vmatmul.mubr.f32.gmra.mxu1 %v4779_v45  ;;  %v4920_v49 = vld [vmem:[#allocation2 + $0x42] sm:$0xff] }
 0x127   : > { %4010 = vmatpush3.msra.mxu0 %v3339_v0  ;;  %v4800_v59 = vld [vmem:[#allocation2 + $0x30] sm:$0xff]  ;;  %3972 = vmatpush3.msra.mxu1 %v3320_v44  ;;  %v3349_v46 = vld [vmem:[%s5362_s3 + $0x240] sm:$0xff] }
 0x128   : > { %1669 = vst [vmem:[#allocation2 + $0x71] sm:$0xff] %v4797_v2  ;;  %4011 = vmatprep.subr.mxu0 %v3338_v60  ;;  %3955 = vmatmul.mubr.f32.gmra.mxu0 %v4800_v59  ;;  %v4913_v39 = vld [vmem:[#allocation2 + $0x32] sm:$0xff]  ;;  %v3365_v57 = vld [vmem:[%s5362_s3 + $0x2c0] sm:$0xff] }
 0x129   : > { %4012 = vmatpush3.msra.mxu0 %v3338_v60  ;;  %3957 = vmatprep.mubr.f32.mxu0 %v4807_v3  ;;  %v4823_v8 = vld [vmem:[#allocation2 + $0x60] sm:$0xff]  ;;  %v3367_v44 = vld [vmem:[%s5362_s3 + $0x2d0] sm:$0xff]  ;;  %v3348_v60 = vld [vmem:[%s5362_s3 + $0x238] sm:$0xff] }
 0x12a   : > { %4013 = vmatprep.subr.mxu0 %v3337_v62  ;;  %3916 = vmatprep.mubr.f32.mxu1 %v4770_v54  ;;  %v4940_v53 = vld [vmem:[#allocation2 + $0x62] sm:$0xff] }
 0x12b   : > { %4014 = vmatpush3.msra.mxu0 %v3337_v62  ;;  %v4817_v5 = vld [vmem:[#allocation2 + $0x50] sm:$0xff]  ;;  %3973 = vmatprep.subr.mxu1 %v3319_v4  ;;  %v3364_v62 = vld [vmem:[%s5362_s3 + $0x2b8] sm:$0xff] }
 0x12c   : > { %4015 = vmatprep.subr.mxu0 %v3336_v61  ;;  %3958 = vmatmul.mubr.f32.gmra.mxu0 %v4817_v5  ;;  %v4933_v43 = vld [vmem:[#allocation2 + $0x52] sm:$0xff] }
 0x12d   : > { %4016 = vmatpush3.msra.mxu0 %v3336_v61  ;;  %3960 = vmatprep.mubr.f32.mxu0 %v4823_v8  ;;  %v4959_v0 = vld [vmem:[#allocation2 + $0x80] sm:$0xff]  ;;  %v3346_v61 = vld [vmem:[%s5362_s3 + $0x228] sm:$0xff] }
 0x12e   : > { %4017 = vmatprep.subr.mxu0 %v3335_v6  ;;  %3974 = vmatpush3.msra.mxu1 %v3319_v4  ;;  %v3347_v4 = vld [vmem:[%s5362_s3 + $0x230] sm:$0xff] }
 0x12f   : > { %4018 = vmatpush3.msra.mxu0 %v3335_v6  ;;  %3975 = vmatprep.subr.mxu1 %v3318_v7  ;;  %v4832_v13 = vld [vmem:[#allocation2 + $0x70] sm:$0xff]  ;;  %v3362_v6 = vld [vmem:[%s5362_s3 + $0x2a8] sm:$0xff] }
 0x130   : > { %4019 = vmatprep.subr.mxu0 %v3334_v10  ;;  %3917 = vmatmul.mubr.f32.gmra.mxu1 %v4797_v2  ;;  %v4953_v27 = vld [vmem:[#allocation2 + $0x72] sm:$0xff] }
 0x131   : > { %3961 = vmatmul.mubr.f32.gmra.mxu0 %v4832_v13  ;;  %3976 = vmatpush3.msra.mxu1 %v3318_v7  ;;  %v3345_v7 = vld [vmem:[%s5362_s3 + $0x220] sm:$0xff] }
 0x132   : > { %4020 = vmatpush3.msra.mxu0 %v3334_v10  ;;  %3977 = vmatprep.subr.mxu1 %v3317_v63  ;;  %v3361_v10 = vld [vmem:[%s5362_s3 + $0x2a0] sm:$0xff] }
 0x133   : > { %4021 = vmatprep.subr.mxu0 %v3333_v9  ;;  %4039 = vmatprep.mubr.f32.mxu0 %v1672_v55  ;;  %v3366_v55 = vld [vmem:[%s5362_s3 + $0x2c8] sm:$0xff] }
 0x134   : > { %3978 = vmatpush3.msra.mxu1 %v3317_v63  ;;  %4022 = vmatpush3.msra.mxu0 %v3333_v9  ;;  %v3344_v63 = vld [vmem:[%s5362_s3 + $0x218] sm:$0xff] }
 0x135   : > { %3979 = vmatprep.subr.mxu1 %v3316_v12  ;;  %4023 = vmatprep.subr.mxu0 %v3332_v18  ;;  %v3360_v9 = vld [vmem:[%s5362_s3 + $0x298] sm:$0xff] }
 0x136   : > { %3980 = vmatpush3.msra.mxu1 %v3316_v12  ;;  %4024 = vmatpush3.msra.mxu0 %v3332_v18  ;;  %v3343_v12 = vld [vmem:[%s5362_s3 + $0x210] sm:$0xff] }
 0x137   : > { %3981 = vmatprep.subr.mxu1 %v3315_v19  ;;  %4025 = vmatprep.subr.mxu0 %v3331_v20  ;;  %v3359_v18 = vld [vmem:[%s5362_s3 + $0x290] sm:$0xff] }
 0x138   : > { %3982 = vmatpush3.msra.mxu1 %v3315_v19  ;;  %4026 = vmatpush3.msra.mxu0 %v3331_v20  ;;  %v3342_v19 = vld [vmem:[%s5362_s3 + $0x208] sm:$0xff] }
 0x139   : > { %3983 = vmatprep.subr.mxu1 %v3314_v21  ;;  %4027 = vmatprep.subr.mxu0 %v3330_v11  ;;  %v3358_v20 = vld [vmem:[%s5362_s3 + $0x288] sm:$0xff] }
 0x13a   : > { %3984 = vmatpush3.msra.mxu1 %v3314_v21  ;;  %4028 = vmatpush3.msra.mxu0 %v3330_v11  ;;  %v3341_v21 = vld [vmem:[%s5362_s3 + $0x200] sm:$0xff] }
 0x13b   : > { %3985 = vmatprep.subr.mxu1 %v3313_v23  ;;  %4029 = vmatprep.subr.mxu0 %v3329_v24  ;;  %v3357_v11 = vld [vmem:[%s5362_s3 + $0x280] sm:$0xff] }
 0x13c   : > { %3986 = vmatpush3.msra.mxu1 %v3313_v23  ;;  %4030 = vmatpush3.msra.mxu0 %v3329_v24  ;;  %v3388_v23 = vld [vmem:[%s5362_s3 + $0x378] sm:$0xff] }
 0x13d   : > { %3987 = vmatprep.subr.mxu1 %v3312_v25  ;;  %4031 = vmatprep.subr.mxu0 %v3328_v15  ;;  %v3404_v24 = vld [vmem:[%s5362_s3 + $0x3f8] sm:$0xff] }
 0x13e   : > { %3988 = vmatpush3.msra.mxu1 %v3312_v25  ;;  %4032 = vmatpush3.msra.mxu0 %v3328_v15  ;;  %v3387_v25 = vld [vmem:[%s5362_s3 + $0x370] sm:$0xff] }
 0x13f   : > { %3989 = vmatprep.subr.mxu1 %v3311_v26  ;;  %4033 = vmatprep.subr.mxu0 %v3327_v28  ;;  %v3403_v15 = vld [vmem:[%s5362_s3 + $0x3f0] sm:$0xff] }
 0x140   : > { %3990 = vmatpush3.msra.mxu1 %v3311_v26  ;;  %4034 = vmatpush3.msra.mxu0 %v3327_v28  ;;  %v3386_v26 = vld [vmem:[%s5362_s3 + $0x368] sm:$0xff] }
 0x141   : > { %3991 = vmatprep.subr.mxu1 %v3310_v29  ;;  %4035 = vmatprep.subr.mxu0 %v3326_v30  ;;  %v3402_v28 = vld [vmem:[%s5362_s3 + $0x3e8] sm:$0xff] }
 0x142   : > { %3992 = vmatpush3.msra.mxu1 %v3310_v29  ;;  %4036 = vmatpush3.msra.mxu0 %v3326_v30  ;;  %v3385_v29 = vld [vmem:[%s5362_s3 + $0x360] sm:$0xff] }
 0x143   : > { %3993 = vmatprep.subr.mxu1 %v3309_v32  ;;  %4037 = vmatprep.subr.mxu0 %v3325_v33  ;;  %v3401_v30 = vld [vmem:[%s5362_s3 + $0x3e0] sm:$0xff] }
 0x144   : > { %3994 = vmatpush3.msra.mxu1 %v3309_v32  ;;  %3995 = vmatprep.mubr.f32.mxu1 %v1930_v34  ;;  %v3384_v32 = vld [vmem:[%s5362_s3 + $0x358] sm:$0xff]  ;;  %v3383_v34 = vld [vmem:[%s5362_s3 + $0x350] sm:$0xff] }
 0x145   : > { %4038 = vmatpush3.msra.mxu0 %v3325_v33  ;;  %3996 = vmatmul.mubr.f32.vlgmr.msra.gmra.mxu1 %v4893_v48  ;;  %v3400_v33 = vld [vmem:[%s5362_s3 + $0x3d8] sm:$0xff] }
 0x146   : > { %4040 = vmatmul.mubr.f32.vlgmr.msra.gmra.mxu0 %v4789_v47  ;;  %4051 = vmatprep.subr.mxu1 %v3356_v35 }
 0x147   : > { %4095 = vmatprep.subr.mxu0 %v3372_v36  ;;  %3998 = vmatprep.mubr.f32.mxu1 %v4900_v37 }
 0x148   : > { %4042 = vmatprep.mubr.f32.mxu0 %v4800_v59  ;;  %4052 = vmatpush3.msra.mxu1 %v3356_v35  ;;  %v3399_v35 = vld [vmem:[%s5362_s3 + $0x3d0] sm:$0xff] }
 0x149   : > { %4096 = vmatpush3.msra.mxu0 %v3372_v36  ;;  %4053 = vmatprep.subr.mxu1 %v3355_v50  ;;  %v3398_v36 = vld [vmem:[%s5362_s3 + $0x3c8] sm:$0xff] }
 0x14a   : > { %4097 = vmatprep.subr.mxu0 %v3371_v17  ;;  %4054 = vmatpush3.msra.mxu1 %v3355_v50  ;;  %v5073_v50 = vld [vmem:[#allocation2 + $0x82] sm:$0xff] }
 0x14b   : > { %4098 = vmatpush3.msra.mxu0 %v3371_v17  ;;  %3999 = vmatmul.mubr.f32.gmra.mxu1 %v4913_v39  ;;  %v3381_v17 = vld [vmem:[%s5362_s3 + $0x340] sm:$0xff] }
 0x14c   : > { %4043 = vmatmul.mubr.f32.gmra.mxu0 %v4807_v3  ;;  %4055 = vmatprep.subr.mxu1 %v3354_v38 }
 0x14d   : > { %4099 = vmatprep.subr.mxu0 %v3370_v40  ;;  %4001 = vmatprep.mubr.f32.mxu1 %v4920_v49 }
 0x14e   : > { %4045 = vmatprep.mubr.f32.mxu0 %v4817_v5  ;;  %4056 = vmatpush3.msra.mxu1 %v3354_v38  ;;  %v3397_v38 = vld [vmem:[%s5362_s3 + $0x3c0] sm:$0xff] }
 0x14f   : > { %4100 = vmatpush3.msra.mxu0 %v3370_v40  ;;  %4057 = vmatprep.subr.mxu1 %v3353_v51  ;;  %v3380_v40 = vld [vmem:[%s5362_s3 + $0x338] sm:$0xff] }
 0x150   : > { %4101 = vmatprep.subr.mxu0 %v3369_v52  ;;  %4058 = vmatpush3.msra.mxu1 %v3353_v51  ;;  %v3396_v51 = vld [vmem:[%s5362_s3 + $0x3b8] sm:$0xff] }
 0x151   : > { %4102 = vmatpush3.msra.mxu0 %v3369_v52  ;;  %4002 = vmatmul.mubr.f32.gmra.mxu1 %v4933_v43  ;;  %v3379_v52 = vld [vmem:[%s5362_s3 + $0x330] sm:$0xff] }
 0x152   : > { %4046 = vmatmul.mubr.f32.gmra.mxu0 %v4823_v8  ;;  %4059 = vmatprep.subr.mxu1 %v3352_v42 }
 0x153   : > { %4103 = vmatprep.subr.mxu0 %v3368_v56  ;;  %4004 = vmatprep.mubr.f32.mxu1 %v4940_v53 }
 0x154   : > { %4048 = vmatprep.mubr.f32.mxu0 %v4832_v13  ;;  %4060 = vmatpush3.msra.mxu1 %v3352_v42  ;;  %v3394_v42 = vld [vmem:[%s5362_s3 + $0x3a8] sm:$0xff] }
 0x155   : > { %4104 = vmatpush3.msra.mxu0 %v3368_v56  ;;  %4061 = vmatprep.subr.mxu1 %v3351_v31  ;;  %v3377_v56 = vld [vmem:[%s5362_s3 + $0x320] sm:$0xff] }
 0x156   : > { %4105 = vmatprep.subr.mxu0 %v3367_v44  ;;  %4062 = vmatpush3.msra.mxu1 %v3351_v31  ;;  %v3393_v31 = vld [vmem:[%s5362_s3 + $0x3a0] sm:$0xff] }
 0x157   : > { %4106 = vmatpush3.msra.mxu0 %v3367_v44  ;;  %4005 = vmatmul.mubr.f32.gmra.mxu1 %v4953_v27  ;;  %v3376_v44 = vld [vmem:[%s5362_s3 + $0x318] sm:$0xff] }
 0x158   : > { %4049 = vmatmul.mubr.f32.gmra.mxu0 %v4959_v0  ;;  %4063 = vmatprep.subr.mxu1 %v3350_v58 }
 0x159   : > { %4107 = vmatprep.subr.mxu0 %v3366_v55  ;;  %4064 = vmatpush3.msra.mxu1 %v3350_v58  ;;  %v3392_v58 = vld [vmem:[%s5362_s3 + $0x398] sm:$0xff] }
 0x15a   : > { %4083 = vmatprep.mubr.f32.mxu1 %v4746_v16  ;;  %4108 = vmatpush3.msra.mxu0 %v3366_v55  ;;  %v3363_v16 = vld [vmem:[%s5362_s3 + $0x2b0] sm:$0xff] }
 0x15b   : > { %4127 = vmatprep.mubr.f32.mxu0 %v4893_v48  ;;  %4065 = vmatprep.subr.mxu1 %v3349_v46  ;;  %v3382_v48 = vld [vmem:[%s5362_s3 + $0x348] sm:$0xff]  ;;  %v3375_v55 = vld [vmem:[%s5362_s3 + $0x310] sm:$0xff] }
 0x15c   : > { %4109 = vmatprep.subr.mxu0 %v3365_v57  ;;  %4066 = vmatpush3.msra.mxu1 %v3349_v46  ;;  %v3391_v46 = vld [vmem:[%s5362_s3 + $0x390] sm:$0xff] }
 0x15d   : > { %4110 = vmatpush3.msra.mxu0 %v3365_v57  ;;  %4067 = vmatprep.subr.mxu1 %v3348_v60  ;;  %v3374_v57 = vld [vmem:[%s5362_s3 + $0x308] sm:$0xff] }
 0x15e   : > { %4111 = vmatprep.subr.mxu0 %v3364_v62  ;;  %4068 = vmatpush3.msra.mxu1 %v3348_v60  ;;  %v3390_v60 = vld [vmem:[%s5362_s3 + $0x388] sm:$0xff] }
 0x15f   : > { %4112 = vmatpush3.msra.mxu0 %v3364_v62  ;;  %4069 = vmatprep.subr.mxu1 %v3347_v4  ;;  %v3373_v62 = vld [vmem:[%s5362_s3 + $0x300] sm:$0xff] }
 0x160   : > { %4113 = vmatprep.subr.mxu0 %v3363_v16  ;;  %4070 = vmatpush3.msra.mxu1 %v3347_v4  ;;  %v3389_v4 = vld [vmem:[%s5362_s3 + $0x380] sm:$0xff] }
 0x161   : > { %4114 = vmatpush3.msra.mxu0 %v3363_v16  ;;  %4071 = vmatprep.subr.mxu1 %v3346_v61  ;;  %v3420_v16 = vld [vmem:[%s5362_s3 + $0x478] sm:$0xff] }
 0x162   : > { %4115 = vmatprep.subr.mxu0 %v3362_v6  ;;  %4072 = vmatpush3.msra.mxu1 %v3346_v61  ;;  %v2920_v61 = vld [vmem:[%s5364_s5] sm:$0xf] }
 0x163   : > { %4116 = vmatpush3.msra.mxu0 %v3362_v6  ;;  %4073 = vmatprep.subr.mxu1 %v3345_v7  ;;  %v3419_v6 = vld [vmem:[%s5362_s3 + $0x470] sm:$0xff] }
 0x164   : > { %4117 = vmatprep.subr.mxu0 %v3361_v10  ;;  %4074 = vmatpush3.msra.mxu1 %v3345_v7  ;;  %v3410_v7 = vld [vmem:[%s5362_s3 + $0x428] sm:$0xff] }
 0x165   : > { %4118 = vmatpush3.msra.mxu0 %v3361_v10  ;;  %4075 = vmatprep.subr.mxu1 %v3344_v63  ;;  %v3425_v10 = vld [vmem:[%s4377_s14 + $0x1e0] sm:$0xff] }
 0x166   : > { %4119 = vmatprep.subr.mxu0 %v3360_v9  ;;  %4076 = vmatpush3.msra.mxu1 %v3344_v63  ;;  %v3426_v63 = vld [vmem:[%s4377_s14 + $0x1f0] sm:$0xff] }
 0x167   : > { %4120 = vmatpush3.msra.mxu0 %v3360_v9  ;;  %4077 = vmatprep.subr.mxu1 %v3343_v12  ;;  %v3409_v9 = vld [vmem:[%s5362_s3 + $0x420] sm:$0xff] }
 0x168   : > { %4121 = vmatprep.subr.mxu0 %v3359_v18  ;;  %4078 = vmatpush3.msra.mxu1 %v3343_v12  ;;  %v3408_v12 = vld [vmem:[%s5362_s3 + $0x418] sm:$0xff] }
 0x169   : > { %4122 = vmatpush3.msra.mxu0 %v3359_v18  ;;  %4079 = vmatprep.subr.mxu1 %v3342_v19  ;;  %v3427_v18 = vld [vmem:[%s4377_s14 + $0x200] sm:$0xff] }
 0x16a   : > { %4123 = vmatprep.subr.mxu0 %v3358_v20  ;;  %4080 = vmatpush3.msra.mxu1 %v3342_v19  ;;  %v3428_v19 = vld [vmem:[%s4377_s14 + $0x210] sm:$0xff] }
 0x16b   : > { %4124 = vmatpush3.msra.mxu0 %v3358_v20  ;;  %4081 = vmatprep.subr.mxu1 %v3341_v21  ;;  %v3407_v20 = vld [vmem:[%s5362_s3 + $0x410] sm:$0xff] }
 0x16c   : > { %4125 = vmatprep.subr.mxu0 %v3357_v11  ;;  %4082 = vmatpush3.msra.mxu1 %v3341_v21  ;;  %v3406_v21 = vld [vmem:[%s5362_s3 + $0x408] sm:$0xff] }
 0x16d   : > { %4126 = vmatpush3.msra.mxu0 %v3357_v11  ;;  %4084 = vmatmul.mubr.f32.vlgmr.msra.gmra.mxu1 %v4741_v22  ;;  %v3429_v11 = vld [vmem:[%s4377_s14 + $0x220] sm:$0xff] }
 0x16e   : > { %4128 = vmatmul.mubr.f32.vlgmr.msra.gmra.mxu0 %v4900_v37  ;;  %4139 = vmatprep.subr.mxu1 %v3388_v23 }
 0x16f   : > { %4183 = vmatprep.subr.mxu0 %v3404_v24  ;;  %4086 = vmatprep.mubr.f32.mxu1 %v4763_v41 }
 0x170   : > { %4130 = vmatprep.mubr.f32.mxu0 %v4913_v39  ;;  %4140 = vmatpush3.msra.mxu1 %v3388_v23  ;;  %v3405_v23 = vld [vmem:[%s5362_s3 + $0x400] sm:$0xff] }
 0x171   : > { %4184 = vmatpush3.msra.mxu0 %v3404_v24  ;;  %4141 = vmatprep.subr.mxu1 %v3387_v25  ;;  %v2766_v24 = vld [vmem:[#allocation2 + $0x92] sm:$0xff] }
 0x172   : > { %4185 = vmatprep.subr.mxu0 %v3403_v15  ;;  %4142 = vmatpush3.msra.mxu1 %v3387_v25 }
 0x173   : > { %4186 = vmatpush3.msra.mxu0 %v3403_v15  ;;  %4087 = vmatmul.mubr.f32.gmra.mxu1 %v4753_v14 }
 0x174   : > { %4131 = vmatmul.mubr.f32.gmra.mxu0 %v4920_v49  ;;  %4143 = vmatprep.subr.mxu1 %v3386_v26 }
 0x175   : > { %4187 = vmatprep.subr.mxu0 %v3402_v28  ;;  %4089 = vmatprep.mubr.f32.mxu1 %v4779_v45 }
 0x176   : > { %4133 = vmatprep.mubr.f32.mxu0 %v4933_v43  ;;  %4144 = vmatpush3.msra.mxu1 %v3386_v26 }
 0x177   : > { %4188 = vmatpush3.msra.mxu0 %v3402_v28  ;;  %4145 = vmatprep.subr.mxu1 %v3385_v29 }
 0x178   : > { %4189 = vmatprep.subr.mxu0 %v3401_v30  ;;  %4146 = vmatpush3.msra.mxu1 %v3385_v29 }
 0x179   : > { %4190 = vmatpush3.msra.mxu0 %v3401_v30  ;;  %4090 = vmatmul.mubr.f32.gmra.mxu1 %v4770_v54 }
 0x17a   : > { %4134 = vmatmul.mubr.f32.gmra.mxu0 %v4940_v53  ;;  %4147 = vmatprep.subr.mxu1 %v3384_v32 }
 0x17b   : > { %4191 = vmatprep.subr.mxu0 %v3400_v33  ;;  %4092 = vmatprep.mubr.f32.mxu1 %v4797_v2 }
 0x17c   : > { %4136 = vmatprep.mubr.f32.mxu0 %v4953_v27  ;;  %4148 = vmatpush3.msra.mxu1 %v3384_v32 }
 0x17d   : > { %4192 = vmatpush3.msra.mxu0 %v3400_v33  ;;  %4149 = vmatprep.subr.mxu1 %v3383_v34 }
 0x17e   : > { %4193 = vmatprep.subr.mxu0 %v3399_v35  ;;  %4150 = vmatpush3.msra.mxu1 %v3383_v34 }
 0x17f   : > { %4194 = vmatpush3.msra.mxu0 %v3399_v35  ;;  %4093 = vmatmul.mubr.f32.gmra.mxu1 %v4786_v1 }
 0x180   : > { %4137 = vmatmul.mubr.f32.gmra.mxu0 %v5073_v50  ;;  %4151 = vmatprep.subr.mxu1 %v3382_v48 }
 0x181   : > { %4195 = vmatprep.subr.mxu0 %v3398_v36  ;;  %4152 = vmatpush3.msra.mxu1 %v3382_v48 }
 0x182   : > { %4171 = vmatprep.mubr.f32.mxu1 %v4789_v47  ;;  %4196 = vmatpush3.msra.mxu0 %v3398_v36  ;;  %v3395_v47 = vld [vmem:[%s5362_s3 + $0x3b0] sm:$0xff] }
 0x183   : > { %4215 = vmatprep.mubr.f32.mxu0 %v4741_v22  ;;  %4153 = vmatprep.subr.mxu1 %v3381_v17  ;;  %v3378_v22 = vld [vmem:[%s5362_s3 + $0x328] sm:$0xff] }
 0x184   : > { %4197 = vmatprep.subr.mxu0 %v3397_v38  ;;  %4154 = vmatpush3.msra.mxu1 %v3381_v17 }
 0x185   : > { %4198 = vmatpush3.msra.mxu0 %v3397_v38  ;;  %4155 = vmatprep.subr.mxu1 %v3380_v40 }
 0x186   : > { %4199 = vmatprep.subr.mxu0 %v3396_v51  ;;  %4156 = vmatpush3.msra.mxu1 %v3380_v40 }
 0x187   : > { %4200 = vmatpush3.msra.mxu0 %v3396_v51  ;;  %4157 = vmatprep.subr.mxu1 %v3379_v52 }
 0x188   : > { %4201 = vmatprep.subr.mxu0 %v3395_v47  ;;  %4158 = vmatpush3.msra.mxu1 %v3379_v52 }
 0x189   : > { %4202 = vmatpush3.msra.mxu0 %v3395_v47  ;;  %4159 = vmatprep.subr.mxu1 %v3378_v22 }
 0x18a   : > { %4203 = vmatprep.subr.mxu0 %v3394_v42  ;;  %4160 = vmatpush3.msra.mxu1 %v3378_v22 }
 0x18b   : > { %4204 = vmatpush3.msra.mxu0 %v3394_v42  ;;  %4161 = vmatprep.subr.mxu1 %v3377_v56 }
 0x18c   : > { %4205 = vmatprep.subr.mxu0 %v3393_v31  ;;  %4162 = vmatpush3.msra.mxu1 %v3377_v56 }
 0x18d   : > { %4206 = vmatpush3.msra.mxu0 %v3393_v31  ;;  %4163 = vmatprep.subr.mxu1 %v3376_v44 }
 0x18e   : > { %4207 = vmatprep.subr.mxu0 %v3392_v58  ;;  %4164 = vmatpush3.msra.mxu1 %v3376_v44 }
 0x18f   : > { %4208 = vmatpush3.msra.mxu0 %v3392_v58  ;;  %4165 = vmatprep.subr.mxu1 %v3375_v55 }
 0x190   : > { %4209 = vmatprep.subr.mxu0 %v3391_v46  ;;  %4166 = vmatpush3.msra.mxu1 %v3375_v55 }
 0x191   : > { %4210 = vmatpush3.msra.mxu0 %v3391_v46  ;;  %4167 = vmatprep.subr.mxu1 %v3374_v57 }
 0x192   : > { %4211 = vmatprep.subr.mxu0 %v3390_v60  ;;  %4168 = vmatpush3.msra.mxu1 %v3374_v57 }
 0x193   : > { %4212 = vmatpush3.msra.mxu0 %v3390_v60  ;;  %4169 = vmatprep.subr.mxu1 %v3373_v62 }
 0x194   : > { %4213 = vmatprep.subr.mxu0 %v3389_v4  ;;  %4170 = vmatpush3.msra.mxu1 %v3373_v62 }
 0x195   : > { %4214 = vmatpush3.msra.mxu0 %v3389_v4  ;;  %4172 = vmatmul.mubr.f32.vlgmr.msra.gmra.mxu1 %v4800_v59  ;;  %v3418_v59 = vld [vmem:[%s5362_s3 + $0x468] sm:$0xff] }
 0x196   : > { %4216 = vmatmul.mubr.f32.vlgmr.msra.gmra.mxu0 %v4763_v41  ;;  %4227 = vmatprep.subr.mxu1 %v3420_v16  ;;  %v3417_v41 = vld [vmem:[%s5362_s3 + $0x460] sm:$0xff] }
 0x197   : > { %4174 = vmatprep.mubr.f32.mxu1 %v4807_v3  ;;  %4218 = vmatprep.mubr.f32.mxu0 %v4753_v14  ;;  %v3416_v14 = vld [vmem:[%s5362_s3 + $0x458] sm:$0xff] }
 0x198   : > { %4228 = vmatpush3.msra.mxu1 %v3420_v16  ;;  %4271 = vmatprep.subr.msk.mxu0 %vm324_vm0, %v2920_v61  ;;  %v2628_v3 = vld [vmem:[#allocation2 + $0x91] sm:$0xff] }
 0x199   : > { %4229 = vmatprep.subr.mxu1 %v3419_v6  ;;  %4175 = vmatmul.mubr.f32.gmra.mxu1 %v4817_v5  ;;  %v4295_v5 = vld [vmem:[#allocation2] sm:$0xff] }
 0x19a   : > { %4230 = vmatpush3.msra.mxu1 %v3419_v6  ;;  %4219 = vmatmul.mubr.f32.gmra.mxu0 %v4779_v45  ;;  %v3415_v45 = vld [vmem:[%s5362_s3 + $0x450] sm:$0xff] }
 0x19b   : > { %4231 = vmatprep.subr.mxu1 %v3418_v59  ;;  %4177 = vmatprep.mubr.f32.mxu1 %v4823_v8  ;;  %v3422_v8 = vld [vmem:[%s4377_s14 + $0x1b0] sm:$0xff] }
 0x19c   : > { %4221 = vmatprep.mubr.f32.mxu0 %v4770_v54  ;;  %4232 = vmatpush3.msra.mxu1 %v3418_v59  ;;  %v3414_v54 = vld [vmem:[%s5362_s3 + $0x448] sm:$0xff] }
 0x19d   : > { %4233 = vmatprep.subr.mxu1 %v3417_v41  ;;  %4178 = vmatmul.mubr.f32.gmra.mxu1 %v4832_v13  ;;  %v3423_v13 = vld [vmem:[%s4377_s14 + $0x1c0] sm:$0xff] }
 0x19e   : > { %4234 = vmatpush3.msra.mxu1 %v3417_v41  ;;  %4222 = vmatmul.mubr.f32.gmra.mxu0 %v4797_v2  ;;  %v3413_v2 = vld [vmem:[%s5362_s3 + $0x440] sm:$0xff] }
 0x19f   : > { %4235 = vmatprep.subr.mxu1 %v3416_v14  ;;  %4180 = vmatprep.mubr.f32.mxu1 %v4959_v0  ;;  %v3411_v0 = vld [vmem:[%s5362_s3 + $0x430] sm:$0xff] }
 0x1a0   : > { %4224 = vmatprep.mubr.f32.mxu0 %v4786_v1  ;;  %4236 = vmatpush3.msra.mxu1 %v3416_v14  ;;  %v3412_v1 = vld [vmem:[%s5362_s3 + $0x438] sm:$0xff] }
 0x1a1   : > { %4237 = vmatprep.subr.mxu1 %v3415_v45  ;;  %4181 = vmatmul.mubr.f32.gmra.mxu1 %v4295_v5 }
 0x1a2   : > { %4238 = vmatpush3.msra.mxu1 %v3415_v45  ;;  %4259 = vmatprep.mubr.f32.mxu1 %v4900_v37  ;;  %v3424_v37 = vld [vmem:[%s4377_s14 + $0x1d0] sm:$0xff] }
 0x1a3   : > { %4239 = vmatprep.subr.mxu1 %v3414_v54  ;;  %4225 = vmatmul.mubr.f32.gmra.mxu0 %v2628_v3 }
 0x1a4   : > { %4240 = vmatpush3.msra.mxu1 %v3414_v54  ;;  %4272 = vmatpush3.msk.msra.mxu0 %vm324_vm0, %v2920_v61 }
 0x1a5   : > { %4241 = vmatprep.subr.mxu1 %v3413_v2  ;;  %4273 = vmatprep.mubr.msk.f32.mxu0 %vm299_vm1, %v3422_v8 }
 0x1a6   : > { %4242 = vmatpush3.msra.mxu1 %v3413_v2 }
 0x1a7   : > { %4243 = vmatprep.subr.mxu1 %v3412_v1  ;;  %4274 = vmatmul.mubr.msk.f32.vlgmr.msra.gmra.mxu0 %vm299_vm1, %v3423_v13 }
 0x1a8   : > { %4244 = vmatpush3.msra.mxu1 %v3412_v1  ;;  %4276 = vmatprep.mubr.msk.f32.mxu0 %vm299_vm1, %v3424_v37 }
 0x1a9   : > { %4245 = vmatprep.subr.mxu1 %v3411_v0 }
 0x1aa   : > { %4246 = vmatpush3.msra.mxu1 %v3411_v0 }
 0x1ab   : > { %4247 = vmatprep.subr.mxu1 %v3410_v7  ;;  %4277 = vmatmul.mubr.msk.f32.gmra.mxu0 %vm299_vm1, %v3425_v10 }
 0x1ac   : > { %4248 = vmatpush3.msra.mxu1 %v3410_v7  ;;  %4279 = vmatprep.mubr.msk.f32.mxu0 %vm299_vm1, %v3426_v63 }
 0x1ad   : > { %4249 = vmatprep.subr.mxu1 %v3409_v9 }
 0x1ae   : > { %4250 = vmatpush3.msra.mxu1 %v3409_v9 }
 0x1af   : > { %4251 = vmatprep.subr.mxu1 %v3408_v12  ;;  %4280 = vmatmul.mubr.msk.f32.gmra.mxu0 %vm299_vm1, %v3427_v18 }
 0x1b0   : > { %4252 = vmatpush3.msra.mxu1 %v3408_v12  ;;  %4282 = vmatprep.mubr.msk.f32.mxu0 %vm299_vm1, %v3428_v19 }
 0x1b1   : > { %4253 = vmatprep.subr.mxu1 %v3407_v20 }
 0x1b2   : > { %4254 = vmatpush3.msra.mxu1 %v3407_v20 }
 0x1b3   : > { %4255 = vmatprep.subr.mxu1 %v3406_v21  ;;  %4283 = vmatmul.mubr.msk.f32.gmra.mxu0 %vm299_vm1, %v3429_v11 }
 0x1b4   : > { %4256 = vmatpush3.msra.mxu1 %v3406_v21 }
 0x1b5   : > { %4257 = vmatprep.subr.mxu1 %v3405_v23 }
 0x1b6   : > { %4258 = vmatpush3.msra.mxu1 %v3405_v23 }
 0x1b7   : > { %4260 = vmatmul.mubr.f32.vlgmr.msra.gmra.mxu1 %v4913_v39 }
 0x1b8   : > { %4262 = vmatprep.mubr.f32.mxu1 %v4920_v49 }
 0x1bb   : > { %4263 = vmatmul.mubr.f32.gmra.mxu1 %v4933_v43 }
 0x1bc   : > { %4265 = vmatprep.mubr.f32.mxu1 %v4940_v53 }
 0x1bf   : > { %4266 = vmatmul.mubr.f32.gmra.mxu1 %v4953_v27 }
 0x1c0   : > { %4268 = vmatprep.mubr.f32.mxu1 %v5073_v50 }
 0x1c3   : > { %4269 = vmatmul.mubr.f32.gmra.mxu1 %v2766_v24 }
 0x1dc   : > { %v3909_v15 = vpop.f32.mrf.mxu1 }
 0x1de   : > { %v1786_v28 = vpop.f32.mrf.mxu1 }
 0x1e0   : > { %v3912_v30 = vpop.f32.mrf.mxu1 }
 0x1e2   : > { %v5224_v49 = vpop.f32.mrf.mxu1 }
 0x1e4   : > { %v3953_v25 = vpop.f32.mrf.mxu0 }
 0x1e5   : > { %v1897_v23 = vadd.f32 %v3953_v25, %v3909_v15 }
 0x1e6   : > { %v1891_v26 = vpop.f32.mrf.mxu0  ;;  %v5228_v53 = vpop.f32.mrf.mxu1 }
 0x1e7   : > { %v1892_v24 = vadd.f32 %v1891_v26, %v1786_v28 }
 0x1e8   : > { %v5220_v29 = vpop.f32.mrf.mxu0  ;;  %v5232_v32 = vpop.f32.mrf.mxu1 }
 0x1ea   : > { %v5222_v39 = vpop.f32.mrf.mxu0 }
 0x1ec   : > { %v5226_v43 = vpop.f32.mrf.mxu0 }
 0x1ee   : > { %v5230_v27 = vpop.f32.mrf.mxu0 }
 0x1ef   : > { %v1912_v25 = vadd.f32 %v5230_v27, %v5232_v32 }
 0x1f0   : > { %v5236_v34 = vpop.f32.mrf.mxu1 }
 0x1f1   : > { %v5234_v33 = vpop.f32.mrf.mxu0 }
 0x1f2   : > { %v5240_v36 = vpop.f32.mrf.mxu1 }
 0x1f3   : > { %v5238_v35 = vpop.f32.mrf.mxu0 }
 0x205   : > { %v3997_v50 = vpop.f32.mrf.mxu1 }
 0x206   : > { %v4041_v48 = vpop.f32.mrf.mxu0 }
 0x207   : > { %v2021_v38 = vpop.f32.mrf.mxu1 }
 0x208   : > { %v2159_v17 = vpop.f32.mrf.mxu0 }
 0x20b   : > { %v4000_v51 = vpop.f32.mrf.mxu1 }
 0x20c   : > { %v4044_v40 = vpop.f32.mrf.mxu0 }
 0x20d   : > { %v2031_v47 = vpop.f32.mrf.mxu1 }
 0x20e   : > { %v2169_v52 = vpop.f32.mrf.mxu0 }
 0x211   : > { %v4003_v42 = vpop.f32.mrf.mxu1 }
 0x212   : > { %v5242_v22 = vpop.f32.mrf.mxu0 }
 0x213   : > { %v2041_v31 = vpop.f32.mrf.mxu1 }
 0x214   : > { %v5244_v56 = vpop.f32.mrf.mxu0 }
 0x217   : > { %v4006_v58 = vpop.f32.mrf.mxu1 }
 0x218   : > { %v5246_v44 = vpop.f32.mrf.mxu0 }
 0x219   : > { %v5250_v57 = vpop.f32.mrf.mxu1 }
 0x21a   : > { %v5248_v55 = vpop.f32.mrf.mxu0 }
 0x22d   : > { %v4085_v60 = vpop.f32.mrf.mxu1 }
 0x22e   : > { %v4129_v46 = vpop.f32.mrf.mxu0 }
 0x22f   : > { %v2297_v4 = vpop.f32.mrf.mxu1 }
 0x230   : > { %v2435_v62 = vpop.f32.mrf.mxu0 }
 0x233   : > { %v4088_v61 = vpop.f32.mrf.mxu1 }
 0x234   : > { %v4132_v16 = vpop.f32.mrf.mxu0 }
 0x235   : > { %v2307_v59 = vpop.f32.mrf.mxu1 }
 0x236   : > { %v5252_v6 = vpop.f32.mrf.mxu0 }
 0x239   : > { %v4091_v14 = vpop.f32.mrf.mxu1 }
 0x23a   : > { %v5254_v41 = vpop.f32.mrf.mxu0 }
 0x23b   : > { %v2317_v54 = vpop.f32.mrf.mxu1 }
 0x23c   : > { %v5256_v45 = vpop.f32.mrf.mxu0 }
 0x23d   : > { %5379 = vst [vmem:[#allocation5_spill] sm:$0xff] %v5256_v45 }
 0x23f   : > { %v5260_v5 = vpop.f32.mrf.mxu1 }
 0x240   : > { %v5258_v3 = vpop.f32.mrf.mxu0  ;;  %5381 = vst [vmem:[#allocation7_spill] sm:$0xff] %v5260_v5 }
 0x241   : > { %5380 = vst [vmem:[#allocation6_spill] sm:$0xff] %v5258_v3  ;;  %v5264_v1 = vpop.f32.mrf.mxu1 }
 0x242   : > { %v5262_v2 = vpop.f32.mrf.mxu0  ;;  %5383 = vst [vmem:[#allocation4_spill] sm:$0xff] %v5264_v1  ;;  %v1907_v1 = vadd.f32 %v5220_v29, %v3912_v30  ;;  %v1927_v29 = vadd.f32 %v5234_v33, %v5236_v34  ;;  %v5300_v33 = vld [vmem:[%s5365_s6] ss:$0 sm:$0xff] }
 0x243   : > { %5382 = vst [vmem:[#allocation3_spill] sm:$0xff] %v5262_v2  ;;  %v2061_v2 = vadd.f32 %v3997_v50, %v1897_v23 }
 0x244   : > { %v2063_v5 = vadd.f32 %v4000_v51, %v1907_v1 }
 0x246   : > { %v2201_v30 = vadd.f32 %v4044_v40, %v2063_v5 }
 0x247   : > { %v5391_v5 = vld [vmem:[#allocation7_spill] sm:$0xff] }
 0x255   : > { %v4173_v37 = vpop.f32.mrf.mxu1 }
 0x256   : > { %v4217_v8 = vpop.f32.mrf.mxu0 }
 0x257   : > { %v2574_v10 = vpop.f32.mrf.mxu1 }
 0x258   : > { %v2712_v13 = vpop.f32.mrf.mxu0 }
 0x259   : > { %v4176_v12 = vpop.f32.mrf.mxu1 }
 0x25a   : > { %v5266_v0 = vpop.f32.mrf.mxu0 }
 0x25b   : > { %5384 = vst [vmem:[#allocation8_spill] sm:$0xff] %v5266_v0  ;;  %v2584_v19 = vpop.f32.mrf.mxu1  ;;  %v2060_v0 = vadd.f32 %v2021_v38, %v1892_v24  ;;  %v2067_v38 = vadd.f32 %v4006_v58, %v1927_v29  ;;  %v5395_v24 = vld [vmem:[#allocation6_spill] sm:$0xff] }
 0x25c   : > { %v5268_v7 = vpop.f32.mrf.mxu0 }
 0x25d   : > { %5385 = vst [vmem:[#allocation9_spill] sm:$0xff] %v5268_v7  ;;  %v5278_v21 = vpop.f32.mrf.mxu1  ;;  %v2205_v40 = vadd.f32 %v5246_v44, %v2067_v38 }
 0x25e   : > { %v5270_v63 = vpop.f32.mrf.mxu0 }
 0x25f   : > { %5386 = vst [vmem:[#allocation10_spill] sm:$0xff] %v5270_v63  ;;  %v5280_v3 = vpop.f32.mrf.mxu1  ;;  %v2199_v63 = vadd.f32 %v4041_v48, %v2061_v2 }
 0x260   : > { %v5272_v9 = vpop.f32.mrf.mxu0 }
 0x261   : > { %5387 = vst [vmem:[#allocation11_spill] sm:$0xff] %v5272_v9  ;;  %v1902_v9 = vadd.f32 %v5222_v39, %v5224_v49  ;;  %v2337_v45 = vadd.f32 %v4085_v60, %v2199_v63  ;;  %v5289_v26 = vpop.f32.mrf.mxu1  ;;  %v2339_v60 = vadd.f32 %v4088_v61, %v2201_v30 }
 0x262   : > { %v5392_v1 = vld [vmem:[#allocation8_spill] sm:$0xff] }
 0x263   : > { %v5274_v18 = vpop.f32.mrf.mxu0  ;;  %v2062_v15 = vadd.f32 %v2031_v47, %v1902_v9  ;;  %v2475_v48 = vadd.f32 %v4129_v46, %v2337_v45  ;;  %v2604_v2 = vpop.f32.mrf.mxu1  ;;  %v5308_v46 = vld [vmem:[%s5363_s4] ss:$0 sm:$0xff] }
 0x264   : > { %5388 = vst [vmem:[#allocation12_spill] sm:$0xff] %v5274_v18  ;;  %v2198_v18 = vadd.f32 %v2159_v17, %v2060_v0  ;;  %v2064_v17 = vadd.f32 %v2041_v31, %v1912_v25  ;;  %v5394_v9 = vld [vmem:[#allocation9_spill] sm:$0xff] }
 0x265   : > { %v5276_v20 = vpop.f32.mrf.mxu0  ;;  %v2200_v39 = vadd.f32 %v2169_v52, %v2062_v15  ;;  %v2477_v52 = vadd.f32 %v4132_v16, %v2339_v60  ;;  %v5396_v15 = vld [vmem:[#allocation3_spill] sm:$0xff] }
 0x266   : > { %5389 = vst [vmem:[#allocation13_spill] sm:$0xff] %v5276_v20  ;;  %v1917_v20 = vadd.f32 %v5226_v43, %v5228_v53  ;;  %v2336_v50 = vadd.f32 %v2297_v4, %v2198_v18  ;;  %v2614_v43 = vadd.f32 %v4173_v37, %v2475_v48  ;;  %v1922_v53 = vadd.f32 %v5238_v35, %v5240_v36  ;;  %v5397_v30 = vld [vmem:[#allocation10_spill] sm:$0xff] }
 0x267   : > { %v4275_v11 = vpop.f32.mrf.mxu0  ;;  %v2202_v32 = vadd.f32 %v5244_v56, %v2064_v17  ;;  %v2338_v47 = vadd.f32 %v2307_v59, %v2200_v39  ;;  %v2616_v4 = vadd.f32 %v4176_v12, %v2477_v52  ;;  %v5390_v59 = vld [vmem:[#allocation5_spill] sm:$0xff] }
 0x268   : > { %v2065_v49 = vadd.f32 %v4003_v42, %v1917_v20  ;;  %v2474_v51 = vadd.f32 %v2435_v62, %v2336_v50  ;;  %v2752_v42 = vadd.f32 %v4217_v8, %v2614_v43  ;;  %v2066_v58 = vadd.f32 %v5250_v57, %v1922_v53  ;;  %v5398_v38 = vld [vmem:[#allocation11_spill] sm:$0xff] }
 0x269   : > { %v3021_v7 = vpop.f32.mrf.mxu0  ;;  %v2476_v35 = vadd.f32 %v5252_v6, %v2338_v47  ;;  %v3027_v44 = vadd.f32 %v4275_v11, %v5300_v33  ;;  %v2343_v8 = vadd.f32 %v5391_v5, %v2205_v40  ;;  %v2754_v37 = vadd.f32 %v5392_v1, %v2616_v4 }
 0x26a   : > { %v2203_v27 = vadd.f32 %v5242_v22, %v2065_v49  ;;  %v2613_v31 = vadd.f32 %v2574_v10, %v2474_v51  ;;  %v2340_v22 = vadd.f32 %v2317_v54, %v2202_v32  ;;  %v2204_v16 = vadd.f32 %v5248_v55, %v2066_v58  ;;  %v5393_v10 = vld [vmem:[#allocation4_spill] sm:$0xff] }
 0x26b   : > { %v4278_v28 = vpop.f32.mrf.mxu0  ;;  %v2481_v25 = vadd.f32 %v5395_v24, %v2343_v8 }
 0x26c   : > { %v2341_v36 = vadd.f32 %v4091_v14, %v2203_v27  ;;  %v2751_v62 = vadd.f32 %v2712_v13, %v2613_v31  ;;  %v2478_v6 = vadd.f32 %v5390_v59, %v2340_v22  ;;  %v2615_v14 = vadd.f32 %v2584_v19, %v2476_v35 }
 0x26d   : > { %v3031_v34 = vpop.f32.mrf.mxu0  ;;  %v2342_v63 = vadd.f32 %v5393_v10, %v2204_v16  ;;  %v3037_v23 = vadd.f32 %v4278_v28, %v5300_v33  ;;  %v2620_v60 = vadd.f32 %v5289_v26, %v2481_v25 }
 0x26e   : > { %v2479_v57 = vadd.f32 %v5254_v41, %v2341_v36  ;;  %v2753_v12 = vadd.f32 %v5394_v9, %v2615_v14  ;;  %v3022_v41 = vadd.f32 %v5300_v33, %v3021_v7  ;;  %v2617_v50 = vadd.f32 %v5280_v3, %v2478_v6 }
 0x26f   : > { %v4281_v54 = vpop.f32.mrf.mxu0  ;;  %v2480_v29 = vadd.f32 %v5396_v15, %v2342_v63  ;;  %v3032_v3 = vadd.f32 %v5300_v33, %v3031_v34 }
 0x270   : > { %v2618_v55 = vadd.f32 %v5278_v21, %v2479_v57  ;;  %v2755_v51 = vadd.f32 %v5398_v38, %v2617_v50  ;;  %v3047_v53 = vadd.f32 %v4281_v54, %v5300_v33 }
 0x271   : > { %v3041_v21 = vpop.f32.mrf.mxu0  ;;  %v2619_v52 = vadd.f32 %v2604_v2, %v2480_v29 }
 0x272   : > { %v2756_v48 = vadd.f32 %v5397_v30, %v2618_v55  ;;  %v3042_v4 = vadd.f32 %v5300_v33, %v3041_v21 }
 0x273   : > { %v4284_v35 = vpop.f32.mrf.mxu0 }
 0x275   : > { %v3051_v14 = vpop.f32.mrf.mxu0 }
 0x277   : > { %v4261_v56 = vpop.f32.mrf.mxu1 }
 0x278   : > { %v2890_v61 = vadd.f32 %v4261_v56, %v2752_v42  ;;  %v5399_v42 = vld [vmem:[#allocation12_spill] sm:$0xff]  ;;  %v5400_v56 = vld [vmem:[#allocation13_spill] sm:$0xff] }
 0x279   : > { %v2850_v45 = vpop.f32.mrf.mxu1  ;;  %v2758_v31 = vadd.f32 %v5399_v42, %v2620_v60 }
 0x27a   : > { %v2905_v0 = vadd.f32 %v5308_v46, %v2890_v61  ;;  %v2889_v13 = vadd.f32 %v2850_v45, %v2751_v62  ;;  %v2757_v62 = vadd.f32 %v5400_v56, %v2619_v52 }
 0x27b   : > { %v4264_v18 = vpop.f32.mrf.mxu1 }
 0x27c   : > { %v3061_v19 = vadd.f32 %v3027_v44, %v2905_v0  ;;  %v2904_v20 = vadd.f32 %v5308_v46, %v2889_v13  ;;  %v2892_v11 = vadd.f32 %v4264_v18, %v2754_v37  ;;  %v3057_v44 = vadd.f32 %v4284_v35, %v5300_v33 }
 0x27d   : > { %v2860_v7 = vpop.f32.mrf.mxu1  ;;  %v3052_v13 = vadd.f32 %v5300_v33, %v3051_v14 }
 0x27e   : > { %v3069_v39 = vmax.f32 %v3061_v19, 0.0  ;;  %v3060_v49 = vadd.f32 %v3022_v41, %v2904_v20  ;;  %v2907_v28 = vadd.f32 %v5308_v46, %v2892_v11  ;;  %v2891_v17 = vadd.f32 %v2860_v7, %v2753_v12 }
 0x27f   : > { %v4267_v43 = vpop.f32.mrf.mxu1 }
 0x280   : > { %3077 = vst [vmem:[%s5331_s22 + $0x8] sm:$0xff] %v3069_v39  ;;  %v3068_v27 = vmax.f32 %v3060_v49, 0.0  ;;  %v3063_v32 = vadd.f32 %v3037_v23, %v2907_v28  ;;  %v2906_v47 = vadd.f32 %v5308_v46, %v2891_v17  ;;  %v2894_v40 = vadd.f32 %v4267_v43, %v2756_v48 }
 0x281   : > { %v2870_v58 = vpop.f32.mrf.mxu1 }
 0x282   : > { %3076 = vst [vmem:[%s5331_s22] sm:$0xff] %v3068_v27  ;;  %v3071_v26 = vmax.f32 %v3063_v32, 0.0  ;;  %v3062_v36 = vadd.f32 %v3032_v3, %v2906_v47  ;;  %v2909_v34 = vadd.f32 %v5308_v46, %v2894_v40  ;;  %v2893_v22 = vadd.f32 %v2870_v58, %v2755_v51 }
 0x283   : > { %v4270_v61 = vpop.f32.mrf.mxu1 }
 0x284   : > { %3079 = vst [vmem:[%s5331_s22 + $0x18] sm:$0xff] %v3071_v26  ;;  %v3070_v2 = vmax.f32 %v3062_v36, 0.0  ;;  %v3065_v16 = vadd.f32 %v3047_v53, %v2909_v34  ;;  %v2908_v57 = vadd.f32 %v5308_v46, %v2893_v22  ;;  %v2896_v59 = vadd.f32 %v4270_v61, %v2758_v31 }
 0x285   : > { %v2880_v6 = vpop.f32.mrf.mxu1 }
 0x286   : > { %3078 = vst [vmem:[%s5331_s22 + $0x10] sm:$0xff] %v3070_v2  ;;  %v3073_v45 = vmax.f32 %v3065_v16, 0.0  ;;  %v3064_v54 = vadd.f32 %v3042_v4, %v2908_v57  ;;  %v2911_v5 = vadd.f32 %v5308_v46, %v2896_v59  ;;  %v2895_v8 = vadd.f32 %v2880_v6, %v2757_v62 }
 0x288   : > { %3081 = vst [vmem:[%s5331_s22 + $0x28] sm:$0xff] %v3073_v45  ;;  %v3072_v1 = vmax.f32 %v3064_v54, 0.0  ;;  %v3067_v37 = vadd.f32 %v3057_v44, %v2911_v5  ;;  %v2910_v0 = vadd.f32 %v5308_v46, %v2895_v8 }
 0x28a   : > { %3080 = vst [vmem:[%s5331_s22 + $0x20] sm:$0xff] %v3072_v1  ;;  %v3075_v10 = vmax.f32 %v3067_v37, 0.0  ;;  %v3066_v63 = vadd.f32 %v3052_v13, %v2910_v0 }
 0x28c   : > { %3083 = vst [vmem:[%s5331_s22 + $0x38] sm:$0xff] %v3075_v10  ;;  %v3074_v9 = vmax.f32 %v3066_v63, 0.0 }
 0x28e   : > { %3082 = vst [vmem:[%s5331_s22 + $0x30] sm:$0xff] %v3074_v9 }
 0x28f PF: > { %s17_s24 = sadd.s32 1, %s4302_s24  }
 0x290   : > { %p14_p4 = scmp.ge.s32.totalorder %s17_s24, 4  }
 0x292   :  { %16 = sbr.rel (!%p14_p4) target bundleno = 1 (0x1), region = 101 }

</bundles_post_ra>
